<compile_context>
chip_gen: v7x
topology: tpu7x:2x2x1
jax: 0.10.0
libtpu: 0.0.40
codegen_flags: <defaults>
</compile_context>

<pallas_src>
import functools
import math

import jax
import jax.numpy as jnp
from jax.experimental import pallas as pl
from jax.experimental.pallas import tpu as pltpu


# -----------------------------------------------------------------------------------
# Kernel.
#   x_ref : (1, R_blk*Wout, KW*Cin)  halo row-block of the kw-windowed input (bf16/f32)
#   w_ref : (KH, KW*Cin, Cout)       conv weight taps, resident                (bf16/f32)
#   p_ref : (3, Cout)                [conv_bias ; ln_gamma ; ln_beta]          (f32)
#   o_ref : (TH*Wout, Cout)          normalized embeddings                     (f32)
# The kh-th lhs is the contiguous slice of `tokens` rows starting at kh*row_off, so the
# conv is KH MXU matmuls with K = KW*Cin accumulated in f32 registers — no reshapes.
# -----------------------------------------------------------------------------------
def _conv_ln_kernel(x_ref, w_ref, p_ref, o_ref, *, kh_taps, row_off, tokens, eps):
    y = None
    for kh in range(kh_taps):                      # static, tiny (KH)
        lhs = x_ref[0, pl.ds(kh * row_off, tokens), :]
        part = jnp.dot(lhs, w_ref[kh], preferred_element_type=jnp.float32)
        y = part if y is None else y + part
    y = y + p_ref[0:1, :]                          # fused conv bias

    # LayerNorm over the embed dim — two-pass variance (numerically safe).
    mean = jnp.mean(y, axis=-1, keepdims=True)
    d = y - mean
    var = jnp.mean(d * d, axis=-1, keepdims=True)
    inv = jax.lax.rsqrt(var + eps)                 # EUP rsqrt
    o_ref[...] = (d * inv * p_ref[1:2, :] + p_ref[2:3, :]).astype(o_ref.dtype)


# ---------------------------- sizing helpers ----------------------------------------
def _round_up(x, m):
    return (x + m - 1) // m * m


def _padded_tile_bytes(rows, cols, itemsize):
    # (sublane, lane) padded VMEM footprint of a 2-D tile (bf16 packs 2/sublane-word).
    sub = max(8, 32 // itemsize)
    return _round_up(max(rows, 1), sub) * _round_up(max(cols, 1), 128) * itemsize


def _vmem_budget_bytes():
    cap = 64 * 1024 * 1024            # conservative default if the query fails
    try:
        info = pltpu.get_tpu_info()
        cap = int(getattr(info, "vmem_capacity_bytes", cap))
    except Exception:
        pass
    # keep ~half of physical VMEM for the compiler / rest of the pipeline:
    # v5e/v6e (128 MiB) -> 64 MiB, v7x (64 MiB per TC) -> 32 MiB.
    return int(min(cap // 2, 64 * 1024 * 1024))


# ---------------------------- public entry point ------------------------------------
def overlap_patch_embed(x_nchw, conv_w, conv_b, ln_w, ln_b, *,
                        patch_size=3, stride=1, eps=1e-5,
                        compute_dtype=jnp.bfloat16, target_tokens=4096):
    N, Cin, H, W = x_nchw.shape
    Cout, Cin_w, KH, KW = conv_w.shape
    assert Cin_w == Cin and KH == patch_size and KW == patch_size
    ph, pw = KH // 2, KW // 2
    Hout = (H + 2 * ph - KH) // stride + 1
    Wout = (W + 2 * pw - KW) // stride + 1
    KWC = KW * Cin
    op_size = jnp.dtype(compute_dtype).itemsize

    budget = _vmem_budget_bytes()

    def block_bytes(th):
        tokens = th * Wout
        r_blk = (th + KH - 1) if stride == 1 else KH * th
        b = 2 * _padded_tile_bytes(r_blk * Wout, KWC, op_size)      # halo input (x2 buffers)
        b += 2 * _padded_tile_bytes(tokens, Cout, 4)                # f32 output (x2 buffers)
        b += 2 * KH * _padded_tile_bytes(KWC, Cout, op_size)        # resident weights
        b += 2 * _padded_tile_bytes(3, Cout, 4)                     # packed bias/gamma/beta
        return b

    # ---- pick the output-row tile TH: large tokens/step, >=2 grid steps, fits VMEM ----
    step = 8 // math.gcd(Wout, 8)                  # smallest TH giving 8-aligned token tiles
    th = max(1, target_tokens // max(1, Wout))
    if N == 1 and Hout > 1:
        th = min(th, -(-Hout // 2))                # keep >= 2 grid steps (v7x has 2 TCs)
    th = _round_up(min(th, Hout), step)
    while block_bytes(th) > (budget * 4) // 5 and th > step:
        smaller = _round_up(max(step, th // 2), step)
        if smaller >= th:
            break
        th = smaller

    TH = th
    tokens = TH * Wout
    TB = -(-Hout // TH)                            # row tiles per image
    Hout_pad = TB * TH
    R_blk = (TH + KH - 1) if stride == 1 else KH * TH
    row_off = Wout if stride == 1 else TH * Wout
    num_blocks = N * TB

    # ---- wrapper-side layout plumbing (no conv compute in HBM) -----------------------
    x_nhwc = jnp.transpose(x_nchw, (0, 2, 3, 1))
    Hp_needed = (Hout_pad - 1) * stride + KH
    pad_bottom = ph + max(0, Hp_needed - (H + 2 * ph))
    x_pad = jnp.pad(x_nhwc, ((0, 0), (ph, pad_bottom), (pw, pw), (0, 0)))
    x_pad = x_pad.astype(compute_dtype)            # bf16 MXU operands (review item #3)

    # kw-only window concat: B[n, h, c, kw*Cin+ci] = x_pad[n, h, c*stride + kw, ci]
    cols = [x_pad[:, :, kw: kw + stride * (Wout - 1) + 1: stride, :] for kw in range(KW)]
    B = jnp.concatenate(cols, axis=-1)             # (N, Hp', Wout, KW*Cin)

    # Per-tile halo row blocks (shared kh rows for stride 1; per-kh segments otherwise).
    if stride == 1:
        tiles = [B[:, t * TH: t * TH + R_blk] for t in range(TB)]
    else:
        tiles = []
        for t in range(TB):
            base = t * TH * stride
            segs = [B[:, base + kh: base + kh + stride * (TH - 1) + 1: stride]
                    for kh in range(KH)]
            tiles.append(jnp.concatenate(segs, axis=1))
    Xb = jnp.stack(tiles, axis=1).reshape(num_blocks, R_blk * Wout, KWC)

    # Weight taps (kw-major, cin-minor rows) and packed affine params.
    w_k = jnp.transpose(conv_w, (2, 3, 1, 0)).reshape(KH, KWC, Cout).astype(compute_dtype)
    params = jnp.stack([conv_b, ln_w, ln_b]).astype(jnp.float32)          # (3, Cout)

    vmem_limit = int(min(budget, max(block_bytes(TH) + (4 << 20), 16 << 20)))

    kernel = functools.partial(_conv_ln_kernel, kh_taps=KH, row_off=row_off,
                               tokens=tokens, eps=eps)

    out = pl.pallas_call(
        kernel,
        out_shape=jax.ShapeDtypeStruct((num_blocks * tokens, Cout), jnp.float32),
        grid_spec=pltpu.PrefetchScalarGridSpec(
            num_scalar_prefetch=0,
            grid=(num_blocks,),
            in_specs=[
                pl.BlockSpec((1, R_blk * Wout, KWC), lambda i: (i, 0, 0)),
                pl.BlockSpec((KH, KWC, Cout), lambda i: (0, 0, 0)),
                pl.BlockSpec((3, Cout), lambda i: (0, 0)),
            ],
            out_specs=pl.BlockSpec((tokens, Cout), lambda i: (i, 0)),
        ),
        compiler_params=pltpu.CompilerParams(
            dimension_semantics=("parallel",),
            vmem_limit_bytes=vmem_limit),
    )(Xb, w_k, params)

    out = out.reshape(N, Hout_pad, Wout, Cout)[:, :Hout]
    return out.astype(x_nchw.dtype)


# ---------------------------- pure-JAX reference -------------------------------------
def reference(x_nchw, conv_w, conv_b, ln_w, ln_b, *, stride=1, eps=1e-5):
    KH, KW = conv_w.shape[2], conv_w.shape[3]
    y = jax.lax.conv_general_dilated(
        x_nchw, conv_w, window_strides=(stride, stride),
        padding=((KH // 2, KH // 2), (KW // 2, KW // 2)),
        dimension_numbers=("NCHW", "OIHW", "NCHW"))
    y = y + conv_b[None, :, None, None]
    y = jnp.transpose(y, (0, 2, 3, 1))
    mean = jnp.mean(y, axis=-1, keepdims=True)
    var = jnp.mean((y - mean) ** 2, axis=-1, keepdims=True)
    return (y - mean) * jax.lax.rsqrt(var + eps) * ln_w + ln_b


if __name__ == "__main__":
    # Small, module-consistent shapes: batch=2, in_chans=4, spatial=16, embed_dim=32.
    N, Cin, H, W = 2, 4, 16, 16
    embed_dim, patch_size, stride = 32, 3, 1

    key = jax.random.PRNGKey(0)
    kx, kw, kb, kg, kbeta = jax.random.split(key, 5)

    x = jax.random.normal(kx, (N, Cin, H, W), dtype=jnp.float32)
    fan_out = patch_size * patch_size * embed_dim
    conv_w = jax.random.normal(kw, (embed_dim, Cin, patch_size, patch_size),
                               dtype=jnp.float32) * math.sqrt(2.0 / fan_out)
    conv_b = 0.1 * jax.random.normal(kb, (embed_dim,), dtype=jnp.float32)
    ln_w = 1.0 + 0.1 * jax.random.normal(kg, (embed_dim,), dtype=jnp.float32)
    ln_b = 0.1 * jax.random.normal(kbeta, (embed_dim,), dtype=jnp.float32)

    ref = jax.block_until_ready(reference(x, conv_w, conv_b, ln_w, ln_b, stride=stride))

    # 1) Exact-semantics check: f32 MXU operands vs the pure-f32 reference.
    out_f32 = jax.block_until_ready(overlap_patch_embed(
        x, conv_w, conv_b, ln_w, ln_b, patch_size=patch_size, stride=stride,
        compute_dtype=jnp.float32))
    assert out_f32.shape == (N, H, W, embed_dim), out_f32.shape
    assert jnp.allclose(out_f32, ref, atol=1e-4, rtol=1e-4), \
        float(jnp.max(jnp.abs(out_f32 - ref)))

    # 2) Default perf path (bf16 MXU operands, f32 accumulation + LayerNorm): compare
    #    against a reference fed the same bf16-rounded conv inputs (tight), plus a loose
    #    check against the pure-f32 reference (input-rounding error only).
    out_bf16 = jax.block_until_ready(overlap_patch_embed(
        x, conv_w, conv_b, ln_w, ln_b, patch_size=patch_size, stride=stride))
    x_r = x.astype(jnp.bfloat16).astype(jnp.float32)
    w_r = conv_w.astype(jnp.bfloat16).astype(jnp.float32)
    ref_r = jax.block_until_ready(reference(x_r, w_r, conv_b, ln_w, ln_b, stride=stride))
    assert out_bf16.shape == (N, H, W, embed_dim), out_bf16.shape
    assert jnp.allclose(out_bf16, ref_r, atol=1e-4, rtol=1e-4), \
        float(jnp.max(jnp.abs(out_bf16 - ref_r)))
    assert jnp.allclose(out_bf16, ref, atol=5e-2, rtol=5e-2), \
        float(jnp.max(jnp.abs(out_bf16 - ref)))

    # 3) Strided variant (stride coverage kept from rev 2).
    out_s2 = jax.block_until_ready(overlap_patch_embed(
        x, conv_w, conv_b, ln_w, ln_b, patch_size=patch_size, stride=2))
    ref_s2 = jax.block_until_ready(reference(x_r, w_r, conv_b, ln_w, ln_b, stride=2))
    assert out_s2.shape == ref_s2.shape == (N, 8, 8, embed_dim), out_s2.shape
    assert jnp.allclose(out_s2, ref_s2, atol=1e-4, rtol=1e-4), \
        float(jnp.max(jnp.abs(out_s2 - ref_s2)))

    print("KERNEL_OK")
</pallas_src>

<mosaic_0001>
module attributes {stable_mosaic.version = 11 : i64} {
  func.func @_conv_ln_kernel(%arg0: i32, %arg1: memref<1x288x12xf32, #tpu.memory_space<vmem>>, %arg2: memref<3x12x32xf32, #tpu.memory_space<vmem>>, %arg3: memref<3x32xf32, #tpu.memory_space<vmem>>, %arg4: memref<256x32xf32, #tpu.memory_space<vmem>>) attributes {dimension_semantics = [#tpu.dimension_semantics<parallel>], iteration_bounds = array<i64: 2>, scalar_prefetch = 0 : i64, scratch_operands = 0 : i64, tpu.core_type = #tpu.core_type<tc>, window_params = [{transform_indices = @transform_0, window_bounds = array<i64: 1, 288, 12>}, {pipeline_mode = #tpu.pipeline_mode<synchronous>, transform_indices = @transform_1, window_bounds = array<i64: 3, 12, 32>}, {pipeline_mode = #tpu.pipeline_mode<synchronous>, transform_indices = @transform_2, window_bounds = array<i64: 3, 32>}, {transform_indices = @transform_3, window_bounds = array<i64: 256, 32>}]} {
    %c0 = arith.constant 0 : index
    %c0_0 = arith.constant 0 : index
    %c0_1 = arith.constant 0 : index
    %0 = vector.load %arg1[%c0, %c0_0, %c0_1] : memref<1x288x12xf32, #tpu.memory_space<vmem>>, vector<1x256x12xf32>
    %1 = vector.shape_cast %0 : vector<1x256x12xf32> to vector<256x12xf32>
    %c0_2 = arith.constant 0 : index
    %c0_3 = arith.constant 0 : index
    %c0_4 = arith.constant 0 : index
    %2 = vector.load %arg2[%c0_2, %c0_3, %c0_4] : memref<3x12x32xf32, #tpu.memory_space<vmem>>, vector<1x12x32xf32>
    %3 = vector.shape_cast %2 : vector<1x12x32xf32> to vector<12x32xf32>
    %cst = arith.constant dense<0.000000e+00> : vector<256x32xf32>
    %4 = tpu.matmul %1, %3, %cst {dimension_numbers = #tpu.dot_dimension_numbers<[1], [0], [0], [1], [0, 0, 1, 1], [], []>} : vector<256x12xf32>, vector<12x32xf32>, vector<256x32xf32> -> vector<256x32xf32>
    %c0_5 = arith.constant 0 : index
    %c16 = arith.constant 16 : index
    %c0_6 = arith.constant 0 : index
    %5 = vector.load %arg1[%c0_5, %c16, %c0_6] : memref<1x288x12xf32, #tpu.memory_space<vmem>>, vector<1x256x12xf32>
    %6 = vector.shape_cast %5 : vector<1x256x12xf32> to vector<256x12xf32>
    %c1 = arith.constant 1 : index
    %c0_7 = arith.constant 0 : index
    %c0_8 = arith.constant 0 : index
    %7 = vector.load %arg2[%c1, %c0_7, %c0_8] : memref<3x12x32xf32, #tpu.memory_space<vmem>>, vector<1x12x32xf32>
    %8 = vector.shape_cast %7 : vector<1x12x32xf32> to vector<12x32xf32>
    %cst_9 = arith.constant dense<0.000000e+00> : vector<256x32xf32>
    %9 = tpu.matmul %6, %8, %cst_9 {dimension_numbers = #tpu.dot_dimension_numbers<[1], [0], [0], [1], [0, 0, 1, 1], [], []>} : vector<256x12xf32>, vector<12x32xf32>, vector<256x32xf32> -> vector<256x32xf32>
    %10 = arith.addf %4, %9 : vector<256x32xf32>
    %c0_10 = arith.constant 0 : index
    %c32 = arith.constant 32 : index
    %c0_11 = arith.constant 0 : index
    %11 = vector.load %arg1[%c0_10, %c32, %c0_11] : memref<1x288x12xf32, #tpu.memory_space<vmem>>, vector<1x256x12xf32>
    %12 = vector.shape_cast %11 : vector<1x256x12xf32> to vector<256x12xf32>
    %c2 = arith.constant 2 : index
    %c0_12 = arith.constant 0 : index
    %c0_13 = arith.constant 0 : index
    %13 = vector.load %arg2[%c2, %c0_12, %c0_13] : memref<3x12x32xf32, #tpu.memory_space<vmem>>, vector<1x12x32xf32>
    %14 = vector.shape_cast %13 : vector<1x12x32xf32> to vector<12x32xf32>
    %cst_14 = arith.constant dense<0.000000e+00> : vector<256x32xf32>
    %15 = tpu.matmul %12, %14, %cst_14 {dimension_numbers = #tpu.dot_dimension_numbers<[1], [0], [0], [1], [0, 0, 1, 1], [], []>} : vector<256x12xf32>, vector<12x32xf32>, vector<256x32xf32> -> vector<256x32xf32>
    %16 = arith.addf %10, %15 : vector<256x32xf32>
    %c0_15 = arith.constant 0 : index
    %c0_16 = arith.constant 0 : index
    %17 = vector.load %arg3[%c0_15, %c0_16] : memref<3x32xf32, #tpu.memory_space<vmem>>, vector<1x32xf32>
    %18 = vector.broadcast %17 : vector<1x32xf32> to vector<256x32xf32>
    %19 = arith.addf %16, %18 : vector<256x32xf32>
    %cst_17 = arith.constant dense<0.000000e+00> : vector<256xf32>
    %20 = vector.multi_reduction <add>, %19, %cst_17 [1] : vector<256x32xf32> to vector<256xf32>
    %21 = vector.shape_cast %20 : vector<256xf32> to vector<256x1xf32>
    %cst_18 = arith.constant 3.200000e+01 : f32
    %22 = vector.broadcast %cst_18 : f32 to vector<256x1xf32>
    %23 = arith.divf %21, %22 : vector<256x1xf32>
    %24 = vector.broadcast %23 : vector<256x1xf32> to vector<256x32xf32>
    %25 = arith.subf %19, %24 : vector<256x32xf32>
    %26 = arith.mulf %25, %25 : vector<256x32xf32>
    %cst_19 = arith.constant dense<0.000000e+00> : vector<256xf32>
    %27 = vector.multi_reduction <add>, %26, %cst_19 [1] : vector<256x32xf32> to vector<256xf32>
    %28 = vector.shape_cast %27 : vector<256xf32> to vector<256x1xf32>
    %cst_20 = arith.constant 3.200000e+01 : f32
    %29 = vector.broadcast %cst_20 : f32 to vector<256x1xf32>
    %30 = arith.divf %28, %29 : vector<256x1xf32>
    %cst_21 = arith.constant 9.99999974E-6 : f32
    %31 = vector.broadcast %cst_21 : f32 to vector<256x1xf32>
    %32 = arith.addf %30, %31 : vector<256x1xf32>
    %33 = math.rsqrt %32 : vector<256x1xf32>
    %34 = vector.broadcast %33 : vector<256x1xf32> to vector<256x32xf32>
    %35 = arith.mulf %25, %34 : vector<256x32xf32>
    %c1_22 = arith.constant 1 : index
    %c0_23 = arith.constant 0 : index
    %36 = vector.load %arg3[%c1_22, %c0_23] : memref<3x32xf32, #tpu.memory_space<vmem>>, vector<1x32xf32>
    %37 = vector.broadcast %36 : vector<1x32xf32> to vector<256x32xf32>
    %38 = arith.mulf %35, %37 : vector<256x32xf32>
    %c2_24 = arith.constant 2 : index
    %c0_25 = arith.constant 0 : index
    %39 = vector.load %arg3[%c2_24, %c0_25] : memref<3x32xf32, #tpu.memory_space<vmem>>, vector<1x32xf32>
    %40 = vector.broadcast %39 : vector<1x32xf32> to vector<256x32xf32>
    %41 = arith.addf %38, %40 : vector<256x32xf32>
    %c0_26 = arith.constant 0 : index
    %c0_27 = arith.constant 0 : index
    %42 = vector.load %arg4[%c0_26, %c0_27] : memref<256x32xf32, #tpu.memory_space<vmem>>, vector<256x32xf32>
    tpu.vector_store %arg4[%c0_26, %c0_27], %41 {strides = array<i32>} : memref<256x32xf32, #tpu.memory_space<vmem>>, vector<256x32xf32>,
    return
  }
  func.func @transform_0(%arg0: i32) -> (i32, i32, i32) {
    %c0_i32 = arith.constant 0 : i32
    %c0_i32_0 = arith.constant 0 : i32
    %c0_i32_1 = arith.constant 0 : i32
    return %arg0, %c0_i32, %c0_i32_0 : i32, i32, i32
  }
  func.func @transform_1(%arg0: i32) -> (i32, i32, i32) {
    %c0_i32 = arith.constant 0 : i32
    %c0_i32_0 = arith.constant 0 : i32
    %c0_i32_1 = arith.constant 0 : i32
    %c0_i32_2 = arith.constant 0 : i32
    return %c0_i32, %c0_i32_0, %c0_i32_1 : i32, i32, i32
  }
  func.func @transform_2(%arg0: i32) -> (i32, i32) {
    %c0_i32 = arith.constant 0 : i32
    %c0_i32_0 = arith.constant 0 : i32
    %c0_i32_1 = arith.constant 0 : i32
    return %c0_i32, %c0_i32_0 : i32, i32
  }
  func.func @transform_3(%arg0: i32) -> (i32, i32) {
    %c0_i32 = arith.constant 0 : i32
    %c0_i32_0 = arith.constant 0 : i32
    return %arg0, %c0_i32 : i32, i32
  }
}

</mosaic_0001>

<bundles_post_ra>
// kernel: tpu_custom_call.1
= control target key start
LH: loop header
LB: loop body
LE: loop exit
PB: predicated region body
PF: predicated region fallthrough
CT: control target
= control target key end

     0   :  { %s2340_s12 = smov 0   ;;  %s3072_s0 = inlined_call_operand.vmem [shape: f32[2,288,12], index: 0, kind: input, shape index: {}]   ;;  %s3073_s1 = inlined_call_operand.vmem [shape: f32[3,12,32], index: 1, kind: input, shape index: {}]   ;;  %s3074_s2 = inlined_call_operand.vmem [shape: f32[3,32], index: 2, kind: input, shape index: {}]   ;;  %s3075_s3 = inlined_call_operand.vmem [shape: f32[512,32], index: 3, kind: output, shape index: {}]  }
   0x1 LB: > { %s2346_s13 = sadd.s32 4294967295, %s2317_s12   ;;  %p1783_p0 = scmp.ge.s32.totalorder %s2317_s12, 1  ;;  %s2317_s12 = sphi %s2340_s12, %s13_s12  }
   0x2   : > { %p137_p1 = scmp.lt.s32.totalorder %s2317_s12, 3 }
   0x4   : > { %p138_p2 = pnand %p1783_p0, %p137_p1 }
   0x5   : > { %v204_v0 = vld [vmem:[%s3073_s1] sm:$0xff] (!%p138_p2)  ;;  %v205_v1 = vld [vmem:[%s3073_s1 + $0x8] sm:$0xf] (!%p138_p2)  ;;  %vm308_vm0 = vcmask (!%p138_p2), 1043456   ;;  %v1787_v2 = vld [vmem:[%s3073_s1 + $0x10] sm:$0xff] (!%p138_p2)  ;;  %vm2319_vm1 = vmmov (!%p138_p2), 1  }
   0x6   : > { %141 = sbr.rel (%p138_p2) target bundleno = 647 (0x287), region = 32  ;;  %vm2359_vm2 = vmpackc.low (!%p138_p2), %vm308_vm0, %vm2319_vm1  ;;  %v2159_v4 = vpack.c.bf16 (!%p138_p2), %v205_v1, %v204_v0  ;;  %v1788_v5 = vld [vmem:[%s3073_s1 + $0x18] sm:$0xf] (!%p138_p2)  ;;  %p161_p3 = scmp.lt.s32.totalorder (!%p138_p2), %s2346_s13, 1  ;;  %v1855_v6 = vld [vmem:[%s3073_s1 + $0x20] sm:$0xff] (!%p138_p2)  ;;  %vm211_vm3 = vcmask (!%p138_p2), 97280  }
   0x7   : > { %v2153_v7 = vpack.c.bf16 (!%p138_p2), %v1788_v5, %v1787_v2  ;;  %v1856_v8 = vld [vmem:[%s3073_s1 + $0x28] sm:$0xf] (!%p138_p2)  ;;  %v2536_v63 = vld [vmem:[%s3074_s2] ss:$0 sm:$0xff] (!%p138_p2)  ;;  %vm1199_vm4 = vcmask (!%p138_p2), 261120   ;;  %s1785_s6 = sshll.u32 (!%p138_p2), %s2346_s13, 5 }
   0x8   : > { %2161 = vmatprep.subr.msk.bf16.mxu0 (!%p138_p2), %vm2359_vm2, %v2159_v4  ;;  %v2165_v9 = vpack.c.bf16 (!%p138_p2), %v1856_v8, %v1855_v6  ;;  %p167_p4 = scmp.lt.s32.totalorder (!%p138_p2), %s1785_s6, 63 }
   0x9   : > { %2155 = vmatprep.subr.msk.bf16.mxu1 (!%p138_p2), %vm2359_vm2, %v2153_v7  ;;  %2164 = vmatpush3.bf16.msk.msra.mxu0 (!%p138_p2), %vm2359_vm2, %v2159_v4 }
   0xa   : > { %2158 = vmatpush3.bf16.msk.msra.mxu1 (!%p138_p2), %vm2359_vm2, %v2153_v7  ;;  %2167 = vmatprep.subr.msk.bf16.mxu0 (!%p138_p2), %vm2359_vm2, %v2165_v9 }
   0xb   : > { %2171 = vmatprep.subr.msk.bf16.mxu1 (!%p138_p2), %vm2359_vm2, %v2159_v4 }
   0xd   : > { %s162_s26 = scalar_select %p161_p3, %s2346_s13, 1 }
   0xe   : > { %s3079_s6 = smov (!%p167_p4, %s1785_s6), 63 }
   0xf   : > { %s2237_s27 = smul.u32 288, %s162_s26  ;;  %s1786_s9 = sshll.u32 %s3079_s6, 3 }
  0x10   : > { %s2909_s15 = scalar_lea.vmem %s3075_s3, %s1786_s9 }
  0x11   : > { %s2389_s30 = scalar_lea.vmem %s3072_s0, %s2237_s27 }
  0x12   : > { %v174_v10 = vld [vmem:[%s2389_s30 + $0x10] sm:$0xff]  ;;  %v172_v11 = vld [vmem:[%s2389_s30] sm:$0xff]  ;;  %v175_v12 = vld [vmem:[%s2389_s30 + $0x18] sm:$0xff] }
  0x13   : > { %2001 = vmatprep.mubr.msk.f32.mxu1 %vm211_vm3, %v174_v10  ;;  %2053 = vmatprep.mubr.msk.f32.mxu0 %vm211_vm3, %v172_v11  ;;  %v173_v13 = vld [vmem:[%s2389_s30 + $0x8] sm:$0xff]  ;;  %v176_v14 = vld [vmem:[%s2389_s30 + $0x20] sm:$0xff]  ;;  %v178_v16 = vld [vmem:[%s2389_s30 + $0x30] sm:$0xff] }
  0x14   : > { %2002 = vmatmul.mubr.msk.f32.vlgmr.msra.gmra.mrb[0].mxu1 %vm211_vm3, %v175_v12  ;;  %2054 = vmatmul.mubr.msk.f32.vlgmr.msra.gmra.mrb[0].mxu0 %vm211_vm3, %v173_v13  ;;  %v177_v15 = vld [vmem:[%s2389_s30 + $0x28] sm:$0xff]  ;;  %v179_v17 = vld [vmem:[%s2389_s30 + $0x38] sm:$0xff]  ;;  %v180_v18 = vld [vmem:[%s2389_s30 + $0x40] sm:$0xff] }
  0x15   : > { %2170 = vmatpush3.bf16.msk.msra.mxu0 %vm2359_vm2, %v2165_v9  ;;  %2004 = vmatprep.mubr.msk.f32.mxu1 %vm211_vm3, %v176_v14  ;;  %v181_v19 = vld [vmem:[%s2389_s30 + $0x48] sm:$0xff]  ;;  %v182_v20 = vld [vmem:[%s2389_s30 + $0x50] sm:$0xff]  ;;  %v183_v21 = vld [vmem:[%s2389_s30 + $0x58] sm:$0xff] }
  0x16   : > { %2172 = vmatpush3.bf16.msk.msra.mxu1 %vm2359_vm2, %v2159_v4  ;;  %2056 = vmatprep.mubr.msk.f32.mxu0 %vm211_vm3, %v174_v10  ;;  %v184_v22 = vld [vmem:[%s2389_s30 + $0x60] sm:$0xff]  ;;  %v185_v23 = vld [vmem:[%s2389_s30 + $0x68] sm:$0xff]  ;;  %v186_v24 = vld [vmem:[%s2389_s30 + $0x70] sm:$0xff] }
  0x17   : > { %v187_v25 = vld [vmem:[%s2389_s30 + $0x78] sm:$0xff]  ;;  %v188_v26 = vld [vmem:[%s2389_s30 + $0x80] sm:$0xff]  ;;  %v189_v27 = vld [vmem:[%s2389_s30 + $0x88] sm:$0xff] }
  0x18   : > { %2005 = vmatmul.mubr.msk.f32.gmra.mrb[2].mxu1 %vm211_vm3, %v177_v15  ;;  %2057 = vmatmul.mubr.msk.f32.gmra.mrb[2].mxu0 %vm211_vm3, %v175_v12  ;;  %v190_v28 = vld [vmem:[%s2389_s30 + $0x90] sm:$0xff]  ;;  %v191_v29 = vld [vmem:[%s2389_s30 + $0x98] sm:$0xff]  ;;  %v192_v30 = vld [vmem:[%s2389_s30 + $0xa0] sm:$0xff] }
  0x19   : > { %2007 = vmatprep.mubr.msk.f32.mxu1 %vm211_vm3, %v178_v16  ;;  %2059 = vmatprep.mubr.msk.f32.mxu0 %vm211_vm3, %v176_v14  ;;  %v193_v31 = vld [vmem:[%s2389_s30 + $0xa8] sm:$0xff]  ;;  %v194_v32 = vld [vmem:[%s2389_s30 + $0xb0] sm:$0xff]  ;;  %v195_v33 = vld [vmem:[%s2389_s30 + $0xb8] sm:$0xff] }
  0x1a   : > { %v196_v34 = vld [vmem:[%s2389_s30 + $0xc0] sm:$0xff]  ;;  %v197_v35 = vld [vmem:[%s2389_s30 + $0xc8] sm:$0xff]  ;;  %v198_v36 = vld [vmem:[%s2389_s30 + $0xd0] sm:$0xff] }
  0x1b   : > { %v199_v37 = vld [vmem:[%s2389_s30 + $0xd8] sm:$0xff]  ;;  %v200_v38 = vld [vmem:[%s2389_s30 + $0xe0] sm:$0xff]  ;;  %v201_v39 = vld [vmem:[%s2389_s30 + $0xe8] sm:$0xff] }
  0x1c   : > { %2008 = vmatmul.mubr.msk.f32.gmra.mrb[4].mxu1 %vm211_vm3, %v179_v17  ;;  %2060 = vmatmul.mubr.msk.f32.gmra.mrb[4].mxu0 %vm211_vm3, %v177_v15  ;;  %v202_v40 = vld [vmem:[%s2389_s30 + $0xf0] sm:$0xff]  ;;  %v203_v41 = vld [vmem:[%s2389_s30 + $0xf8] sm:$0xff]  ;;  %v206_v42 = vld [vmem:[%s2389_s30 + $0x100] sm:$0xff] }
  0x1d   : > { %2010 = vmatprep.mubr.msk.f32.mxu1 %vm211_vm3, %v180_v18  ;;  %2062 = vmatprep.mubr.msk.f32.mxu0 %vm211_vm3, %v178_v16  ;;  %v207_v43 = vld [vmem:[%s2389_s30 + $0x108] sm:$0xff]  ;;  %v801_v44 = vld [vmem:[%s2389_s30 + $0x110] sm:$0xff]  ;;  %v802_v45 = vld [vmem:[%s2389_s30 + $0x118] sm:$0xff] }
  0x20   : > { %2011 = vmatmul.mubr.msk.f32.gmra.mrb[6].mxu1 %vm211_vm3, %v181_v19  ;;  %2063 = vmatmul.mubr.msk.f32.gmra.mrb[6].mxu0 %vm211_vm3, %v179_v17 }
  0x21   : > { %2013 = vmatprep.mubr.msk.f32.mxu1 %vm211_vm3, %v182_v20  ;;  %2065 = vmatprep.mubr.msk.f32.mxu0 %vm211_vm3, %v180_v18 }
  0x24   : > { %2014 = vmatmul.mubr.msk.f32.gmra.mrb[8].mxu1 %vm211_vm3, %v183_v21  ;;  %2066 = vmatmul.mubr.msk.f32.gmra.mrb[8].mxu0 %vm211_vm3, %v181_v19 }
  0x25   : > { %2016 = vmatprep.mubr.msk.f32.mxu1 %vm211_vm3, %v184_v22  ;;  %2068 = vmatprep.mubr.msk.f32.mxu0 %vm211_vm3, %v182_v20 }
  0x28   : > { %2017 = vmatmul.mubr.msk.f32.gmra.mrb[10].mxu1 %vm211_vm3, %v185_v23  ;;  %2069 = vmatmul.mubr.msk.f32.gmra.mrb[10].mxu0 %vm211_vm3, %v183_v21 }
  0x29   : > { %2019 = vmatprep.mubr.msk.f32.mxu1 %vm211_vm3, %v186_v24  ;;  %2071 = vmatprep.mubr.msk.f32.mxu0 %vm211_vm3, %v184_v22 }
  0x2c   : > { %2020 = vmatmul.mubr.msk.f32.gmra.mrb[12].mxu1 %vm211_vm3, %v187_v25  ;;  %2072 = vmatmul.mubr.msk.f32.gmra.mrb[12].mxu0 %vm211_vm3, %v185_v23 }
  0x2d   : > { %2022 = vmatprep.mubr.msk.f32.mxu1 %vm211_vm3, %v188_v26  ;;  %2074 = vmatprep.mubr.msk.f32.mxu0 %vm211_vm3, %v186_v24 }
  0x30   : > { %2023 = vmatmul.mubr.msk.f32.gmra.mrb[14].mxu1 %vm211_vm3, %v189_v27  ;;  %2075 = vmatmul.mubr.msk.f32.gmra.mrb[14].mxu0 %vm211_vm3, %v187_v25 }
  0x31   : > { %2025 = vmatprep.mubr.msk.f32.mxu1 %vm211_vm3, %v190_v28  ;;  %2105 = vmatprep.mubr.msk.f32.mxu0 %vm211_vm3, %v176_v14 }
  0x34   : > { %2026 = vmatmul.mubr.msk.f32.gmra.mrb[16].mxu1 %vm211_vm3, %v191_v29  ;;  %2106 = vmatmul.mubr.msk.f32.vlgmr.msra.gmra.mrb[0].mxu0 %vm211_vm3, %v177_v15 }
  0x35   : > { %2028 = vmatprep.mubr.msk.f32.mxu1 %vm211_vm3, %v192_v30  ;;  %2108 = vmatprep.mubr.msk.f32.mxu0 %vm211_vm3, %v178_v16 }
  0x38   : > { %2029 = vmatmul.mubr.msk.f32.gmra.mrb[18].mxu1 %vm211_vm3, %v193_v31  ;;  %2109 = vmatmul.mubr.msk.f32.gmra.mrb[2].mxu0 %vm211_vm3, %v179_v17 }
  0x39   : > { %2031 = vmatprep.mubr.msk.f32.mxu1 %vm211_vm3, %v194_v32  ;;  %2111 = vmatprep.mubr.msk.f32.mxu0 %vm211_vm3, %v180_v18 }
  0x3c   : > { %2032 = vmatmul.mubr.msk.f32.gmra.mrb[20].mxu1 %vm211_vm3, %v195_v33  ;;  %2112 = vmatmul.mubr.msk.f32.gmra.mrb[4].mxu0 %vm211_vm3, %v181_v19 }
  0x3d   : > { %2034 = vmatprep.mubr.msk.f32.mxu1 %vm211_vm3, %v196_v34  ;;  %2114 = vmatprep.mubr.msk.f32.mxu0 %vm211_vm3, %v182_v20 }
  0x40   : > { %2035 = vmatmul.mubr.msk.f32.gmra.mrb[22].mxu1 %vm211_vm3, %v197_v35  ;;  %2115 = vmatmul.mubr.msk.f32.gmra.mrb[6].mxu0 %vm211_vm3, %v183_v21 }
  0x41   : > { %2037 = vmatprep.mubr.msk.f32.mxu1 %vm211_vm3, %v198_v36  ;;  %2117 = vmatprep.mubr.msk.f32.mxu0 %vm211_vm3, %v184_v22 }
  0x44   : > { %2038 = vmatmul.mubr.msk.f32.gmra.mrb[24].mxu1 %vm211_vm3, %v199_v37  ;;  %2118 = vmatmul.mubr.msk.f32.gmra.mrb[8].mxu0 %vm211_vm3, %v185_v23 }
  0x45   : > { %2040 = vmatprep.mubr.msk.f32.mxu1 %vm211_vm3, %v200_v38  ;;  %2120 = vmatprep.mubr.msk.f32.mxu0 %vm211_vm3, %v186_v24 }
  0x48   : > { %2041 = vmatmul.mubr.msk.f32.gmra.mrb[26].mxu1 %vm211_vm3, %v201_v39  ;;  %2121 = vmatmul.mubr.msk.f32.gmra.mrb[10].mxu0 %vm211_vm3, %v187_v25 }
  0x49   : > { %2043 = vmatprep.mubr.msk.f32.mxu1 %vm211_vm3, %v202_v40  ;;  %2123 = vmatprep.mubr.msk.f32.mxu0 %vm211_vm3, %v188_v26 }
  0x4c   : > { %2044 = vmatmul.mubr.msk.f32.gmra.mrb[28].mxu1 %vm211_vm3, %v203_v41  ;;  %2124 = vmatmul.mubr.msk.f32.gmra.mrb[12].mxu0 %vm211_vm3, %v189_v27 }
  0x4d   : > { %2046 = vmatprep.mubr.msk.f32.mxu1 %vm211_vm3, %v206_v42  ;;  %2126 = vmatprep.mubr.msk.f32.mxu0 %vm211_vm3, %v190_v28 }
  0x50   : > { %2047 = vmatmul.mubr.msk.f32.gmra.mrb[30].mxu1 %vm211_vm3, %v207_v43  ;;  %2127 = vmatmul.mubr.msk.f32.gmra.mrb[14].mxu0 %vm211_vm3, %v191_v29 }
  0x51   : > { %2077 = vmatprep.mubr.msk.f32.mxu1 %vm211_vm3, %v188_v26  ;;  %2129 = vmatprep.mubr.msk.f32.mxu0 %vm211_vm3, %v192_v30 }
  0x54   : > { %2078 = vmatmul.mubr.msk.f32.vlgmr.msra.gmra.mrb[16].mxu1 %vm211_vm3, %v189_v27  ;;  %2130 = vmatmul.mubr.msk.f32.gmra.mrb[16].mxu0 %vm211_vm3, %v193_v31 }
  0x55   : > { %2080 = vmatprep.mubr.msk.f32.mxu1 %vm211_vm3, %v190_v28  ;;  %2132 = vmatprep.mubr.msk.f32.mxu0 %vm211_vm3, %v194_v32 }
  0x58   : > { %2081 = vmatmul.mubr.msk.f32.gmra.mrb[18].mxu1 %vm211_vm3, %v191_v29  ;;  %2133 = vmatmul.mubr.msk.f32.gmra.mrb[18].mxu0 %vm211_vm3, %v195_v33 }
  0x59   : > { %2083 = vmatprep.mubr.msk.f32.mxu1 %vm211_vm3, %v192_v30  ;;  %2135 = vmatprep.mubr.msk.f32.mxu0 %vm211_vm3, %v196_v34 }
  0x5c   : > { %2084 = vmatmul.mubr.msk.f32.gmra.mrb[20].mxu1 %vm211_vm3, %v193_v31  ;;  %2136 = vmatmul.mubr.msk.f32.gmra.mrb[20].mxu0 %vm211_vm3, %v197_v35 }
  0x5d   : > { %2086 = vmatprep.mubr.msk.f32.mxu1 %vm211_vm3, %v194_v32  ;;  %2138 = vmatprep.mubr.msk.f32.mxu0 %vm211_vm3, %v198_v36 }
  0x60   : > { %2087 = vmatmul.mubr.msk.f32.gmra.mrb[22].mxu1 %vm211_vm3, %v195_v33  ;;  %2139 = vmatmul.mubr.msk.f32.gmra.mrb[22].mxu0 %vm211_vm3, %v199_v37 }
  0x61   : > { %2089 = vmatprep.mubr.msk.f32.mxu1 %vm211_vm3, %v196_v34  ;;  %2141 = vmatprep.mubr.msk.f32.mxu0 %vm211_vm3, %v200_v38 }
  0x64   : > { %2090 = vmatmul.mubr.msk.f32.gmra.mrb[24].mxu1 %vm211_vm3, %v197_v35  ;;  %2142 = vmatmul.mubr.msk.f32.gmra.mrb[24].mxu0 %vm211_vm3, %v201_v39 }
  0x65   : > { %2092 = vmatprep.mubr.msk.f32.mxu1 %vm211_vm3, %v198_v36  ;;  %2144 = vmatprep.mubr.msk.f32.mxu0 %vm211_vm3, %v202_v40 }
  0x68   : > { %2093 = vmatmul.mubr.msk.f32.gmra.mrb[26].mxu1 %vm211_vm3, %v199_v37  ;;  %2145 = vmatmul.mubr.msk.f32.gmra.mrb[26].mxu0 %vm211_vm3, %v203_v41 }
  0x69   : > { %2095 = vmatprep.mubr.msk.f32.mxu1 %vm211_vm3, %v200_v38  ;;  %2147 = vmatprep.mubr.msk.f32.mxu0 %vm211_vm3, %v206_v42 }
  0x6c   : > { %2096 = vmatmul.mubr.msk.f32.gmra.mrb[28].mxu1 %vm211_vm3, %v201_v39  ;;  %2148 = vmatmul.mubr.msk.f32.gmra.mrb[28].mxu0 %vm211_vm3, %v207_v43 }
  0x6d   : > { %2098 = vmatprep.mubr.msk.f32.mxu1 %vm211_vm3, %v202_v40  ;;  %2150 = vmatprep.mubr.msk.f32.mxu0 %vm211_vm3, %v801_v44 }
  0x70   : > { %2099 = vmatmul.mubr.msk.f32.gmra.mrb[30].mxu1 %vm211_vm3, %v203_v41  ;;  %2151 = vmatmul.mubr.msk.f32.gmra.mrb[30].mxu0 %vm211_vm3, %v802_v45 }
  0xe7   : > { %v2003_v46 = vpop.f32.mrb[0].mxu1 }
  0xe8   : > { %v378_v47 = vpop.f32.mrb[1].mxu1 }
  0xeb   : > { %v2006_v48 = vpop.f32.mrb[2].mxu1 }
  0xec   : > { %v388_v49 = vpop.f32.mrb[3].mxu1 }
  0xef   : > { %v2009_v50 = vpop.f32.mrb[4].mxu1 }
  0xf0   : > { %v398_v51 = vpop.f32.mrb[5].mxu1 }
  0xf3   : > { %v2012_v52 = vpop.f32.mrb[6].mxu1 }
  0xf4   : > { %v408_v53 = vpop.f32.mrb[7].mxu1 }
  0xf7   : > { %v2015_v54 = vpop.f32.mrb[8].mxu1 }
  0xf8   : > { %v418_v55 = vpop.f32.mrb[9].mxu1 }
  0xfb   : > { %v2018_v56 = vpop.f32.mrb[10].mxu1 }
  0xfc   : > { %v428_v57 = vpop.f32.mrb[11].mxu1 }
  0xff   : > { %v2021_v58 = vpop.f32.mrb[12].mxu1 }
 0x100   : > { %v2527_v59 = vpop.f32.mrb[13].mxu1 }
 0x103   : > { %v2529_v60 = vpop.f32.mrb[14].mxu1 }
 0x104   : > { %v2531_v61 = vpop.f32.mrb[15].mxu1 }
 0x107   : > { %v2107_v62 = vpop.f32.mrb[0].mxu0 }
 0x108   : > { %v2173_v0 = vadd.f32 %v2107_v62, %v2003_v46  ;;  %v971_v1 = vpop.f32.mrb[1].mxu0 }
 0x109   : > { %v2174_v2 = vadd.f32 %v971_v1, %v378_v47 }
 0x10a   : > { %v2539_v3 = vadd.f32 %v2173_v0, %v2536_v63 }
 0x10b   : > { %v2110_v4 = vpop.f32.mrb[2].mxu0  ;;  %v2544_v8 = vadd.f32 %v2174_v2, %v2536_v63 }
 0x10c   : > { %v2175_v5 = vadd.f32 %v2110_v4, %v2006_v48  ;;  %v981_v6 = vpop.f32.mrb[3].mxu0  ;;  %v1203_v7 = vsel %vm1199_vm4, %v2539_v3, 0.0 }
 0x10d   : > { %v2176_v9 = vadd.f32 %v981_v6, %v388_v49  ;;  %1204 = vadd.xlane.f32.xlu0 %v1203_v7  ;;  %v1200_v14 = vsel %vm1199_vm4, %v2544_v8, 0.0 }
 0x10e   : > { %v2547_v10 = vadd.f32 %v2175_v5, %v2536_v63 }
 0x10f   : > { %v2113_v11 = vpop.f32.mrb[4].mxu0  ;;  %v2554_v16 = vadd.f32 %v2176_v9, %v2536_v63 }
 0x110   : > { %v2177_v12 = vadd.f32 %v2113_v11, %v2009_v50  ;;  %v991_v13 = vpop.f32.mrb[5].mxu0  ;;  %v1209_v15 = vsel %vm1199_vm4, %v2547_v10, 0.0 }
 0x111   : > { %v2178_v17 = vadd.f32 %v991_v13, %v398_v51  ;;  %1201 = vadd.xlane.f32.xlu0 %v1200_v14  ;;  %1210 = vadd.xlane.f32.xlu1 %v1209_v15  ;;  %v1206_v22 = vsel %vm1199_vm4, %v2554_v16, 0.0 }
 0x112   : > { %v2562_v23 = vadd.f32 %v2177_v12, %v2536_v63 }
 0x113   : > { %v2116_v18 = vpop.f32.mrb[6].mxu0  ;;  %v2557_v19 = vadd.f32 %v2178_v17, %v2536_v63 }
 0x114   : > { %v2179_v20 = vadd.f32 %v2116_v18, %v2012_v52  ;;  %v1001_v21 = vpop.f32.mrb[7].mxu0  ;;  %v1215_v30 = vsel %vm1199_vm4, %v2562_v23, 0.0 }
 0x115   : > { %v2180_v24 = vadd.f32 %v1001_v21, %v408_v53  ;;  %1207 = vadd.xlane.f32.xlu1 %v1206_v22  ;;  %v1212_v25 = vsel %vm1199_vm4, %v2557_v19, 0.0 }
 0x116   : > { %1213 = vadd.xlane.f32.xlu0 %v1212_v25  ;;  %v2572_v31 = vadd.f32 %v2179_v20, %v2536_v63 }
 0x117   : > { %v2119_v26 = vpop.f32.mrb[8].mxu0  ;;  %v2567_v27 = vadd.f32 %v2180_v24, %v2536_v63 }
 0x118   : > { %v2181_v28 = vadd.f32 %v2119_v26, %v2015_v54  ;;  %v1011_v29 = vpop.f32.mrb[9].mxu0  ;;  %v1221_v38 = vsel %vm1199_vm4, %v2572_v31, 0.0 }
 0x119   : > { %v2182_v32 = vadd.f32 %v1011_v29, %v418_v55  ;;  %1216 = vadd.xlane.f32.xlu1 %v1215_v30  ;;  %v1218_v33 = vsel %vm1199_vm4, %v2567_v27, 0.0 }
 0x11a   : > { %1219 = vadd.xlane.f32.xlu0 %v1218_v33  ;;  %v2582_v39 = vadd.f32 %v2181_v28, %v2536_v63 }
 0x11b   : > { %v2122_v34 = vpop.f32.mrb[10].mxu0  ;;  %v2577_v35 = vadd.f32 %v2182_v32, %v2536_v63 }
 0x11c   : > { %v2183_v36 = vadd.f32 %v2122_v34, %v2018_v56  ;;  %v1021_v37 = vpop.f32.mrb[11].mxu0  ;;  %v1227_v46 = vsel %vm1199_vm4, %v2582_v39, 0.0 }
 0x11d   : > { %v2184_v40 = vadd.f32 %v1021_v37, %v428_v57  ;;  %1222 = vadd.xlane.f32.xlu1 %v1221_v38  ;;  %v1224_v41 = vsel %vm1199_vm4, %v2577_v35, 0.0 }
 0x11e   : > { %1225 = vadd.xlane.f32.xlu0 %v1224_v41  ;;  %v2592_v47 = vadd.f32 %v2183_v36, %v2536_v63 }
 0x11f   : > { %v2125_v42 = vpop.f32.mrb[12].mxu0  ;;  %v2587_v43 = vadd.f32 %v2184_v40, %v2536_v63 }
 0x120   : > { %v2185_v44 = vadd.f32 %v2125_v42, %v2021_v58  ;;  %v1031_v45 = vpop.f32.mrb[13].mxu0  ;;  %v1233_v54 = vsel %vm1199_vm4, %v2592_v47, 0.0 }
 0x121   : > { %v2186_v48 = vadd.f32 %v1031_v45, %v2527_v59  ;;  %1228 = vadd.xlane.f32.xlu1 %v1227_v46  ;;  %v1230_v49 = vsel %vm1199_vm4, %v2587_v43, 0.0 }
 0x122   : > { %1231 = vadd.xlane.f32.xlu0 %v1230_v49  ;;  %v2604_v55 = vadd.f32 %v2185_v44, %v2536_v63 }
 0x123   : > { %v2128_v50 = vpop.f32.mrb[14].mxu0  ;;  %v2598_v51 = vadd.f32 %v2186_v48, %v2536_v63 }
 0x124   : > { %v2187_v52 = vadd.f32 %v2128_v50, %v2529_v60  ;;  %v1041_v53 = vpop.f32.mrb[15].mxu0  ;;  %v1239_v2 = vsel %vm1199_vm4, %v2604_v55, 0.0 }
 0x125   : > { %v2188_v56 = vadd.f32 %v1041_v53, %v2531_v61  ;;  %1234 = vadd.xlane.f32.xlu1 %v1233_v54  ;;  %v1236_v57 = vsel %vm1199_vm4, %v2598_v51, 0.0 }
 0x126   : > { %1237 = vadd.xlane.f32.xlu0 %v1236_v57  ;;  %v2615_v4 = vadd.f32 %v2187_v52, %v2536_v63 }
 0x127   : > { %v2079_v58 = vpop.f32.mrb[16].mxu1  ;;  %v2131_v59 = vpop.f32.mrb[16].mxu0  ;;  %v2610_v62 = vadd.f32 %v2188_v56, %v2536_v63 }
 0x128   : > { %v2189_v60 = vadd.f32 %v2131_v59, %v2079_v58  ;;  %v692_v0 = vpop.f32.mrb[17].mxu1  ;;  %v1051_v1 = vpop.f32.mrb[17].mxu0  ;;  %v1245_v14 = vsel %vm1199_vm4, %v2615_v4, 0.0 }
 0x129   : > { %v2190_v61 = vadd.f32 %v1051_v1, %v692_v0  ;;  %1240 = vadd.xlane.f32.xlu1 %v1239_v2  ;;  %v1242_v5 = vsel %vm1199_vm4, %v2610_v62, 0.0 }
 0x12a   : > { %1243 = vadd.xlane.f32.xlu0 %v1242_v5  ;;  %v2625_v15 = vadd.f32 %v2189_v60, %v2536_v63 }
 0x12b   : > { %v2082_v6 = vpop.f32.mrb[18].mxu1  ;;  %v2134_v7 = vpop.f32.mrb[18].mxu0  ;;  %v2620_v9 = vadd.f32 %v2190_v61, %v2536_v63 }
 0x12c   : > { %v2191_v11 = vadd.f32 %v2134_v7, %v2082_v6  ;;  %v702_v12 = vpop.f32.mrb[19].mxu1  ;;  %v1061_v13 = vpop.f32.mrb[19].mxu0  ;;  %v1251_v28 = vsel %vm1199_vm4, %v2625_v15, 0.0 }
 0x12d   : > { %v2192_v17 = vadd.f32 %v1061_v13, %v702_v12  ;;  %1246 = vadd.xlane.f32.xlu1 %v1245_v14  ;;  %v1248_v18 = vsel %vm1199_vm4, %v2620_v9, 0.0 }
 0x12e   : > { %1249 = vadd.xlane.f32.xlu0 %v1248_v18  ;;  %v2635_v29 = vadd.f32 %v2191_v11, %v2536_v63 }
 0x12f   : > { %v2085_v20 = vpop.f32.mrb[20].mxu1  ;;  %v2137_v21 = vpop.f32.mrb[20].mxu0  ;;  %v2630_v22 = vadd.f32 %v2192_v17, %v2536_v63 }
 0x130   : > { %v2193_v24 = vadd.f32 %v2137_v21, %v2085_v20  ;;  %v712_v25 = vpop.f32.mrb[21].mxu1  ;;  %v1071_v26 = vpop.f32.mrb[21].mxu0  ;;  %v1257_v41 = vsel %vm1199_vm4, %v2635_v29, 0.0 }
 0x131   : > { %v2194_v30 = vadd.f32 %v1071_v26, %v712_v25  ;;  %1252 = vadd.xlane.f32.xlu1 %v1251_v28  ;;  %v1254_v32 = vsel %vm1199_vm4, %v2630_v22, 0.0 }
 0x132   : > { %1255 = vadd.xlane.f32.xlu0 %v1254_v32  ;;  %v2645_v42 = vadd.f32 %v2193_v24, %v2536_v63 }
 0x133   : > { %v2088_v33 = vpop.f32.mrb[22].mxu1  ;;  %v2140_v34 = vpop.f32.mrb[22].mxu0  ;;  %v2640_v36 = vadd.f32 %v2194_v30, %v2536_v63 }
 0x134   : > { %v2195_v37 = vadd.f32 %v2140_v34, %v2088_v33  ;;  %v722_v38 = vpop.f32.mrb[23].mxu1  ;;  %v1081_v40 = vpop.f32.mrb[23].mxu0  ;;  %v1263_v54 = vsel %vm1199_vm4, %v2645_v42, 0.0 }
 0x135   : > { %v2196_v44 = vadd.f32 %v1081_v40, %v722_v38  ;;  %1258 = vadd.xlane.f32.xlu1 %v1257_v41  ;;  %v1260_v45 = vsel %vm1199_vm4, %v2640_v36, 0.0 }
 0x136   : > { %1261 = vadd.xlane.f32.xlu0 %v1260_v45  ;;  %v2655_v56 = vadd.f32 %v2195_v37, %v2536_v63 }
 0x137   : > { %v2091_v46 = vpop.f32.mrb[24].mxu1  ;;  %v2143_v48 = vpop.f32.mrb[24].mxu0  ;;  %v2650_v49 = vadd.f32 %v2196_v44, %v2536_v63 }
 0x138   : > { %v2197_v50 = vadd.f32 %v2143_v48, %v2091_v46  ;;  %v732_v52 = vpop.f32.mrb[25].mxu1  ;;  %v1091_v53 = vpop.f32.mrb[25].mxu0  ;;  %v1269_v5 = vsel %vm1199_vm4, %v2655_v56, 0.0 }
 0x139   : > { %v2198_v57 = vadd.f32 %v1091_v53, %v732_v52  ;;  %1264 = vadd.xlane.f32.xlu1 %v1263_v54  ;;  %v1266_v58 = vsel %vm1199_vm4, %v2650_v49, 0.0 }
 0x13a   : > { %1267 = vadd.xlane.f32.xlu0 %v1266_v58  ;;  %v2665_v6 = vadd.f32 %v2197_v50, %v2536_v63 }
 0x13b   : > { %v2094_v59 = vpop.f32.mrb[26].mxu1  ;;  %v2146_v60 = vpop.f32.mrb[26].mxu0  ;;  %v2660_v0 = vadd.f32 %v2198_v57, %v2536_v63 }
 0x13c   : > { %v2199_v1 = vadd.f32 %v2146_v60, %v2094_v59  ;;  %v742_v2 = vpop.f32.mrb[27].mxu1  ;;  %v1101_v61 = vpop.f32.mrb[27].mxu0  ;;  %v1275_v21 = vsel %vm1199_vm4, %v2665_v6, 0.0 }
 0x13d   : > { %v2200_v7 = vadd.f32 %v1101_v61, %v742_v2  ;;  %1270 = vadd.xlane.f32.xlu1 %v1269_v5  ;;  %v1272_v11 = vsel %vm1199_vm4, %v2660_v0, 0.0 }
 0x13e   : > { %1273 = vadd.xlane.f32.xlu0 %v1272_v11  ;;  %v2675_v24 = vadd.f32 %v2199_v1, %v2536_v63 }
 0x13f   : > { %v2097_v12 = vpop.f32.mrb[28].mxu1  ;;  %v2149_v13 = vpop.f32.mrb[28].mxu0  ;;  %v2670_v14 = vadd.f32 %v2200_v7, %v2536_v63 }
 0x140   : > { %v2201_v17 = vadd.f32 %v2149_v13, %v2097_v12  ;;  %v752_v18 = vpop.f32.mrb[29].mxu1  ;;  %v1111_v20 = vpop.f32.mrb[29].mxu0  ;;  %v1281_v38 = vsel %vm1199_vm4, %v2675_v24, 0.0 }
 0x141   : > { %v2202_v25 = vadd.f32 %v1111_v20, %v752_v18  ;;  %1276 = vadd.xlane.f32.xlu1 %v1275_v21  ;;  %v1278_v26 = vsel %vm1199_vm4, %v2670_v14, 0.0 }
 0x142   : > { %1279 = vadd.xlane.f32.xlu0 %v1278_v26  ;;  %v2685_v40 = vadd.f32 %v2201_v17, %v2536_v63 }
 0x143   : > { %v2100_v28 = vpop.f32.mrb[30].mxu1  ;;  %v2152_v30 = vpop.f32.mrb[30].mxu0  ;;  %v2680_v32 = vadd.f32 %v2202_v25, %v2536_v63 }
 0x144   : > { %v2203_v33 = vadd.f32 %v2152_v30, %v2100_v28  ;;  %v762_v34 = vpop.f32.mrb[31].mxu1  ;;  %v1121_v37 = vpop.f32.mrb[31].mxu0  ;;  %v1287_v48 = vsel %vm1199_vm4, %v2685_v40, 0.0 }
 0x145   : > { %v2204_v41 = vadd.f32 %v1121_v37, %v762_v34  ;;  %1282 = vadd.xlane.f32.xlu1 %v1281_v38  ;;  %v1284_v44 = vsel %vm1199_vm4, %v2680_v32, 0.0 }
 0x146   : > { %1285 = vadd.xlane.f32.xlu0 %v1284_v44  ;;  %v2690_v45 = vadd.f32 %v2203_v33, %v2536_v63 }
 0x147   : > { %v2693_v46 = vadd.f32 %v2204_v41, %v2536_v63 }
 0x148   : > { %v1293_v52 = vsel %vm1199_vm4, %v2690_v45, 0.0 }
 0x149   : > { %1288 = vadd.xlane.f32.xlu1 %v1287_v48  ;;  %v1290_v50 = vsel %vm1199_vm4, %v2693_v46, 0.0 }
 0x14a   : > { %1291 = vadd.xlane.f32.xlu0 %v1290_v50 }
 0x14d   : > { %1294 = vadd.xlane.f32.xlu1 %v1293_v52 }
 0x19a   : > { %v1205_v53 = vpop.xlane.xlu0 %1204 }
 0x19b   : > { %v1298_v54 = vmul.f32 0.03125, %v1205_v53 }
 0x19d   : > { %v2702_v57 = vsub.f32 %v2539_v3, %v1298_v54 }
 0x19e   : > { %v1202_v58 = vpop.xlane.xlu0 %1201  ;;  %v1211_v63 = vpop.xlane.xlu1 %1210 }
 0x19f   : > { %v1297_v59 = vmul.f32 0.03125, %v1202_v58  ;;  %v1300_v60 = vmul.f32 0.03125, %v1211_v63  ;;  %v1362_v1 = vmul.f32 %v2702_v57, %v2702_v57 }
 0x1a1   : > { %v2707_v2 = vsub.f32 %v2544_v8, %v1297_v59  ;;  %v2710_v61 = vsub.f32 %v2547_v10, %v1300_v60  ;;  %v1396_v5 = vsel %vm1199_vm4, %v1362_v1, 0.0 }
 0x1a2   : > { %v1208_v7 = vpop.xlane.xlu1 %1207  ;;  %1397 = vadd.xlane.f32.xlu1 %v1396_v5 }
 0x1a3   : > { %v1299_v11 = vmul.f32 0.03125, %v1208_v7  ;;  %v1214_v3 = vpop.xlane.xlu0 %1213  ;;  %v1364_v12 = vmul.f32 %v2710_v61, %v2710_v61  ;;  %v1361_v13 = vmul.f32 %v2707_v2, %v2707_v2 }
 0x1a4   : > { %v1301_v17 = vmul.f32 0.03125, %v1214_v3 }
 0x1a5   : > { %v2718_v18 = vsub.f32 %v2554_v16, %v1299_v11  ;;  %v1402_v8 = vsel %vm1199_vm4, %v1364_v12, 0.0  ;;  %v1393_v10 = vsel %vm1199_vm4, %v1361_v13, 0.0 }
 0x1a6   : > { %v2723_v20 = vsub.f32 %v2557_v19, %v1301_v17  ;;  %v1217_v21 = vpop.xlane.xlu1 %1216  ;;  %1403 = vadd.xlane.f32.xlu1 %v1402_v8  ;;  %1394 = vadd.xlane.f32.xlu0 %v1393_v10 }
 0x1a7   : > { %v1302_v25 = vmul.f32 0.03125, %v1217_v21  ;;  %v1220_v26 = vpop.xlane.xlu0 %1219  ;;  %v1363_v28 = vmul.f32 %v2718_v18, %v2718_v18 }
 0x1a8   : > { %v1303_v30 = vmul.f32 0.03125, %v1220_v26  ;;  %v1365_v34 = vmul.f32 %v2723_v20, %v2723_v20 }
 0x1a9   : > { %v2728_v33 = vsub.f32 %v2562_v23, %v1302_v25  ;;  %v1399_v16 = vsel %vm1199_vm4, %v1363_v28, 0.0 }
 0x1aa   : > { %v2734_v19 = vsub.f32 %v2567_v27, %v1303_v30  ;;  %v1223_v37 = vpop.xlane.xlu1 %1222  ;;  %1400 = vadd.xlane.f32.xlu0 %v1399_v16  ;;  %v1405_v52 = vsel %vm1199_vm4, %v1365_v34, 0.0 }
 0x1ab   : > { %v1304_v38 = vmul.f32 0.03125, %v1223_v37  ;;  %v1226_v41 = vpop.xlane.xlu0 %1225  ;;  %v1366_v44 = vmul.f32 %v2728_v33, %v2728_v33 }
 0x1ac   : > { %v1305_v48 = vmul.f32 0.03125, %v1226_v41  ;;  %v1367_v53 = vmul.f32 %v2734_v19, %v2734_v19 }
 0x1ad   : > { %v2739_v50 = vsub.f32 %v2572_v31, %v1304_v38  ;;  %v1408_v23 = vsel %vm1199_vm4, %v1366_v44, 0.0 }
 0x1ae   : > { %v2746_v27 = vsub.f32 %v2577_v35, %v1305_v48  ;;  %v1229_v54 = vpop.xlane.xlu1 %1228  ;;  %1409 = vadd.xlane.f32.xlu1 %v1408_v23  ;;  %1406 = vadd.xlane.f32.xlu0 %v1405_v52  ;;  %v1411_v5 = vsel %vm1199_vm4, %v1367_v53, 0.0 }
 0x1af   : > { %v1306_v58 = vmul.f32 0.03125, %v1229_v54  ;;  %v1232_v63 = vpop.xlane.xlu0 %1231  ;;  %v1368_v59 = vmul.f32 %v2739_v50, %v2739_v50 }
 0x1b0   : > { %v1307_v31 = vmul.f32 0.03125, %v1232_v63  ;;  %v1369_v35 = vmul.f32 %v2746_v27, %v2746_v27 }
 0x1b1   : > { %v2751_v60 = vsub.f32 %v2582_v39, %v1306_v58  ;;  %v1414_v1 = vsel %vm1199_vm4, %v1368_v59, 0.0 }
 0x1b2   : > { %v2758_v7 = vsub.f32 %v2587_v43, %v1307_v31  ;;  %v1235_v11 = vpop.xlane.xlu1 %1234  ;;  %1415 = vadd.xlane.f32.xlu1 %v1414_v1  ;;  %1412 = vadd.xlane.f32.xlu0 %v1411_v5  ;;  %v1417_v10 = vsel %vm1199_vm4, %v1369_v35, 0.0 }
 0x1b3   : > { %v1308_v3 = vmul.f32 0.03125, %v1235_v11  ;;  %v1238_v12 = vpop.xlane.xlu0 %1237  ;;  %v1370_v13 = vmul.f32 %v2751_v60, %v2751_v60 }
 0x1b4   : > { %v1309_v39 = vmul.f32 0.03125, %v1238_v12  ;;  %v1371_v43 = vmul.f32 %v2758_v7, %v2758_v7 }
 0x1b5   : > { %v2763_v17 = vsub.f32 %v2592_v47, %v1308_v3  ;;  %v1420_v8 = vsel %vm1199_vm4, %v1370_v13, 0.0 }
 0x1b6   : > { %v2770_v21 = vsub.f32 %v2598_v51, %v1309_v39  ;;  %v1241_v25 = vpop.xlane.xlu1 %1240  ;;  %1421 = vadd.xlane.f32.xlu1 %v1420_v8  ;;  %1418 = vadd.xlane.f32.xlu0 %v1417_v10  ;;  %v1423_v37 = vsel %vm1199_vm4, %v1371_v43, 0.0 }
 0x1b7   : > { %v1310_v26 = vmul.f32 0.03125, %v1241_v25  ;;  %v1244_v28 = vpop.xlane.xlu0 %1243  ;;  %v1372_v30 = vmul.f32 %v2763_v17, %v2763_v17 }
 0x1b8   : > { %v1311_v47 = vmul.f32 0.03125, %v1244_v28  ;;  %v1373_v51 = vmul.f32 %v2770_v21, %v2770_v21 }
 0x1b9   : > { %v2775_v16 = vsub.f32 %v2604_v55, %v1310_v26  ;;  %v1426_v34 = vsel %vm1199_vm4, %v1372_v30, 0.0 }
 0x1ba   : > { %v2782_v38 = vsub.f32 %v2610_v62, %v1311_v47  ;;  %v1247_v41 = vpop.xlane.xlu1 %1246  ;;  %1427 = vadd.xlane.f32.xlu1 %v1426_v34  ;;  %1424 = vadd.xlane.f32.xlu0 %v1423_v37  ;;  %v1429_v54 = vsel %vm1199_vm4, %v1373_v51, 0.0 }
 0x1bb   : > { %v1312_v44 = vmul.f32 0.03125, %v1247_v41  ;;  %v1250_v48 = vpop.xlane.xlu0 %1249  ;;  %v1374_v23 = vmul.f32 %v2775_v16, %v2775_v16 }
 0x1bc   : > { %v1313_v55 = vmul.f32 0.03125, %v1250_v48  ;;  %v1375_v62 = vmul.f32 %v2782_v38, %v2782_v38 }
 0x1bd   : > { %v2787_v52 = vsub.f32 %v2615_v4, %v1312_v44  ;;  %v1432_v53 = vsel %vm1199_vm4, %v1374_v23, 0.0 }
 0x1be   : > { %v2794_v58 = vsub.f32 %v2620_v9, %v1313_v55  ;;  %v1253_v63 = vpop.xlane.xlu1 %1252  ;;  %1433 = vadd.xlane.f32.xlu1 %v1432_v53  ;;  %1430 = vadd.xlane.f32.xlu0 %v1429_v54  ;;  %v1435_v11 = vsel %vm1199_vm4, %v1375_v62, 0.0 }
 0x1bf   : > { %v1314_v59 = vmul.f32 0.03125, %v1253_v63  ;;  %v1256_v31 = vpop.xlane.xlu0 %1255  ;;  %v1376_v1 = vmul.f32 %v2787_v52, %v2787_v52 }
 0x1c0   : > { %v1315_v4 = vmul.f32 0.03125, %v1256_v31  ;;  %v1377_v9 = vmul.f32 %v2794_v58, %v2794_v58 }
 0x1c1   : > { %v2799_v5 = vsub.f32 %v2625_v15, %v1314_v59  ;;  %v1438_v35 = vsel %vm1199_vm4, %v1376_v1, 0.0 }
 0x1c2   : > { %v2806_v3 = vsub.f32 %v2630_v22, %v1315_v4  ;;  %v1259_v12 = vpop.xlane.xlu1 %1258  ;;  %1439 = vadd.xlane.f32.xlu1 %v1438_v35  ;;  %1436 = vadd.xlane.f32.xlu0 %v1435_v11  ;;  %v1441_v25 = vsel %vm1199_vm4, %v1377_v9, 0.0 }
 0x1c3   : > { %v1316_v13 = vmul.f32 0.03125, %v1259_v12  ;;  %v1262_v39 = vpop.xlane.xlu0 %1261  ;;  %v1378_v8 = vmul.f32 %v2799_v5, %v2799_v5 }
 0x1c4   : > { %v1317_v15 = vmul.f32 0.03125, %v1262_v39  ;;  %v1379_v22 = vmul.f32 %v2806_v3, %v2806_v3 }
 0x1c5   : > { %v2811_v10 = vsub.f32 %v2635_v29, %v1316_v13  ;;  %v1444_v43 = vsel %vm1199_vm4, %v1378_v8, 0.0 }
 0x1c6   : > { %v2818_v26 = vsub.f32 %v2640_v36, %v1317_v15  ;;  %v1265_v28 = vpop.xlane.xlu1 %1264  ;;  %1445 = vadd.xlane.f32.xlu1 %v1444_v43  ;;  %1442 = vadd.xlane.f32.xlu0 %v1441_v25  ;;  %v1447_v41 = vsel %vm1199_vm4, %v1379_v22, 0.0 }
 0x1c7   : > { %v1318_v30 = vmul.f32 0.03125, %v1265_v28  ;;  %v1268_v47 = vpop.xlane.xlu0 %1267  ;;  %v1380_v34 = vmul.f32 %v2811_v10, %v2811_v10 }
 0x1c8   : > { %v1319_v29 = vmul.f32 0.03125, %v1268_v47  ;;  %v1381_v36 = vmul.f32 %v2818_v26, %v2818_v26 }
 0x1c9   : > { %v2823_v37 = vsub.f32 %v2645_v42, %v1318_v30  ;;  %v1450_v51 = vsel %vm1199_vm4, %v1380_v34, 0.0 }
 0x1ca   : > { %v2830_v44 = vsub.f32 %v2650_v49, %v1319_v29  ;;  %v1271_v48 = vpop.xlane.xlu1 %1270  ;;  %1451 = vadd.xlane.f32.xlu1 %v1450_v51  ;;  %1448 = vadd.xlane.f32.xlu0 %v1447_v41  ;;  %v1453_v63 = vsel %vm1199_vm4, %v1381_v36, 0.0 }
 0x1cb   : > { %v1320_v23 = vmul.f32 0.03125, %v1271_v48  ;;  %v1274_v55 = vpop.xlane.xlu0 %1273  ;;  %v1382_v53 = vmul.f32 %v2823_v37, %v2823_v37 }
 0x1cc   : > { %v1321_v42 = vmul.f32 0.03125, %v1274_v55  ;;  %v1383_v49 = vmul.f32 %v2830_v44, %v2830_v44 }
 0x1cd   : > { %v2835_v54 = vsub.f32 %v2655_v56, %v1320_v23  ;;  %v1456_v62 = vsel %vm1199_vm4, %v1382_v53, 0.0 }
 0x1ce   : > { %v2842_v59 = vsub.f32 %v2660_v0, %v1321_v42  ;;  %v1277_v31 = vpop.xlane.xlu1 %1276  ;;  %1457 = vadd.xlane.f32.xlu1 %v1456_v62  ;;  %1454 = vadd.xlane.f32.xlu0 %v1453_v63  ;;  %v1459_v12 = vsel %vm1199_vm4, %v1383_v49, 0.0 }
 0x1cf   : > { %v1322_v1 = vmul.f32 0.03125, %v1277_v31  ;;  %v1280_v4 = vpop.xlane.xlu0 %1279  ;;  %v1384_v35 = vmul.f32 %v2835_v54, %v2835_v54 }
 0x1d0   : > { %v1323_v56 = vmul.f32 0.03125, %v1280_v4  ;;  %v1385_v0 = vmul.f32 %v2842_v59, %v2842_v59 }
 0x1d1   : > { %v2847_v11 = vsub.f32 %v2665_v6, %v1322_v1  ;;  %v1462_v9 = vsel %vm1199_vm4, %v1384_v35, 0.0 }
 0x1d2   : > { %v2854_v13 = vsub.f32 %v2670_v14, %v1323_v56  ;;  %v1283_v39 = vpop.xlane.xlu1 %1282  ;;  %1463 = vadd.xlane.f32.xlu1 %v1462_v9  ;;  %1460 = vadd.xlane.f32.xlu0 %v1459_v12  ;;  %v1465_v28 = vsel %vm1199_vm4, %v1385_v0, 0.0 }
 0x1d3   : > { %v1324_v8 = vmul.f32 0.03125, %v1283_v39  ;;  %v1286_v15 = vpop.xlane.xlu0 %1285  ;;  %v1386_v43 = vmul.f32 %v2847_v11, %v2847_v11 }
 0x1d4   : > { %v1325_v6 = vmul.f32 0.03125, %v1286_v15  ;;  %v1387_v14 = vmul.f32 %v2854_v13, %v2854_v13 }
 0x1d5   : > { %v2859_v25 = vsub.f32 %v2675_v24, %v1324_v8  ;;  %v1468_v22 = vsel %vm1199_vm4, %v1386_v43, 0.0 }
 0x1d6   : > { %v2866_v30 = vsub.f32 %v2680_v32, %v1325_v6  ;;  %v1289_v47 = vpop.xlane.xlu1 %1288  ;;  %1469 = vadd.xlane.f32.xlu1 %v1468_v22  ;;  %1466 = vadd.xlane.f32.xlu0 %v1465_v28  ;;  %v1471_v48 = vsel %vm1199_vm4, %v1387_v14, 0.0 }
 0x1d7   : > { %v1326_v34 = vmul.f32 0.03125, %v1289_v47  ;;  %v1292_v29 = vpop.xlane.xlu0 %1291  ;;  %v1388_v51 = vmul.f32 %v2859_v25, %v2859_v25 }
 0x1d8   : > { %v1327_v24 = vmul.f32 0.03125, %v1292_v29  ;;  %v1389_v32 = vmul.f32 %v2866_v30, %v2866_v30  ;;  %v2897_v29 = vld [vmem:[%s3074_s2 + $0x1] ss:$0 sm:$0xff] }
 0x1d9   : > { %v2871_v41 = vsub.f32 %v2685_v40, %v1326_v34  ;;  %v1474_v36 = vsel %vm1199_vm4, %v1388_v51, 0.0 }
 0x1da   : > { %v2878_v23 = vsub.f32 %v2693_v46, %v1327_v24  ;;  %1475 = vadd.xlane.f32.xlu1 %v1474_v36  ;;  %v1295_v55 = vpop.xlane.xlu1 %1294  ;;  %1472 = vadd.xlane.f32.xlu0 %v1471_v48  ;;  %v1477_v63 = vsel %vm1199_vm4, %v1389_v32, 0.0 }
 0x1db   : > { %v1328_v53 = vmul.f32 0.03125, %v1295_v55  ;;  %v1390_v42 = vmul.f32 %v2871_v41, %v2871_v41  ;;  %v2903_v55 = vld [vmem:[%s3074_s2 + $0x2] ss:$0 sm:$0xff] }
 0x1dc   : > { %v1391_v49 = vmul.f32 %v2878_v23, %v2878_v23 }
 0x1dd   : > { %v2883_v40 = vsub.f32 %v2690_v45, %v1328_v53  ;;  %v1480_v62 = vsel %vm1199_vm4, %v1390_v42, 0.0 }
 0x1de   : > { %1481 = vadd.xlane.f32.xlu1 %v1480_v62  ;;  %1478 = vadd.xlane.f32.xlu0 %v1477_v63  ;;  %v1483_v1 = vsel %vm1199_vm4, %v1391_v49, 0.0 }
 0x1df   : > { %v1392_v46 = vmul.f32 %v2883_v40, %v2883_v40 }
 0x1e1   : > { %v1486_v31 = vsel %vm1199_vm4, %v1392_v46, 0.0 }
 0x1e2   : > { %1487 = vadd.xlane.f32.xlu1 %v1486_v31  ;;  %1484 = vadd.xlane.f32.xlu0 %v1483_v1 }
 0x22f   : > { %v1398_v45 = vpop.xlane.xlu1 %1397 }
 0x230   : > { %v1490_v4 = vmul.f32 0.03125, %v1398_v45 }
 0x232   : > { %v1522_v35 = vadd.f32 1e-05, %v1490_v4 }
 0x233   : > { %v1404_v56 = vpop.xlane.xlu1 %1403  ;;  %v1395_v9 = vpop.xlane.xlu0 %1394 }
 0x234   : > { %2247 = vrsqrt.f32 %v1522_v35  ;;  %v1492_v12 = vmul.f32 0.03125, %v1404_v56  ;;  %v1489_v0 = vmul.f32 0.03125, %v1395_v9 }
 0x236   : > { %v1524_v39 = vadd.f32 1e-05, %v1492_v12  ;;  %v1521_v8 = vadd.f32 1e-05, %v1489_v0 }
 0x237   : > { %v1401_v15 = vpop.xlane.xlu0 %1400 }
 0x238   : > { %2249 = vrsqrt.f32 %v1524_v39  ;;  %v1491_v43 = vmul.f32 0.03125, %v1401_v15 }
 0x239   : > { %2251 = vrsqrt.f32 %v1521_v8 }
 0x23a   : > { %v1523_v6 = vadd.f32 1e-05, %v1491_v43 }
 0x23b   : > { %v1410_v22 = vpop.xlane.xlu1 %1409  ;;  %v1407_v28 = vpop.xlane.xlu0 %1406 }
 0x23c   : > { %2253 = vrsqrt.f32 %v1523_v6  ;;  %v1494_v14 = vmul.f32 0.03125, %v1410_v22  ;;  %v1493_v47 = vmul.f32 0.03125, %v1407_v28 }
 0x23e   : > { %v2248_v34 = vpop.eup %2247  ;;  %v1526_v51 = vadd.f32 1e-05, %v1494_v14  ;;  %v1525_v24 = vadd.f32 1e-05, %v1493_v47 }
 0x23f   : > { %v1586_v36 = vmul.f32 %v2248_v34, %v2702_v57  ;;  %v1416_v48 = vpop.xlane.xlu1 %1415  ;;  %v1413_v32 = vpop.xlane.xlu0 %1412 }
 0x240   : > { %2255 = vrsqrt.f32 %v1526_v51  ;;  %v1496_v53 = vmul.f32 0.03125, %v1416_v48  ;;  %v1495_v42 = vmul.f32 0.03125, %v1413_v32 }
 0x241   : > { %v1623_v62 = vmul.f32 %v2897_v29, %v1586_v36  ;;  %2257 = vrsqrt.f32 %v1525_v24 }
 0x242   : > { %v2250_v63 = vpop.eup %2249  ;;  %v1528_v57 = vadd.f32 1e-05, %v1496_v53  ;;  %v1527_v49 = vadd.f32 1e-05, %v1495_v42 }
 0x243   : > { %v2252_v46 = vpop.eup %2251  ;;  %v1660_v31 = vadd.f32 %v2903_v55, %v1623_v62  ;;  %v1588_v1 = vmul.f32 %v2250_v63, %v2710_v61  ;;  %v1422_v45 = vpop.xlane.xlu1 %1421 }
 0x244   : > { %v1419_v4 = vpop.xlane.xlu0 %1418  ;;  %v1585_v35 = vmul.f32 %v2252_v46, %v2707_v2  ;;  %2259 = vrsqrt.f32 %v1528_v57  ;;  %v1498_v56 = vmul.f32 0.03125, %v1422_v45 }
 0x245   : > { %v1497_v9 = vmul.f32 0.03125, %v1419_v4  ;;  %1692 = vst.msk [vmem:[%s2909_s15 + $0x8] sm:$0xff] %vm1199_vm4, %v1660_v31  ;;  %v1625_v12 = vmul.f32 %v2897_v29, %v1588_v1  ;;  %2261 = vrsqrt.f32 %v1527_v49 }
 0x246   : > { %v2254_v0 = vpop.eup %2253  ;;  %v1622_v39 = vmul.f32 %v2897_v29, %v1585_v35  ;;  %v1530_v8 = vadd.f32 1e-05, %v1498_v56 }
 0x247   : > { %v1529_v15 = vadd.f32 1e-05, %v1497_v9  ;;  %v1662_v61 = vadd.f32 %v2903_v55, %v1625_v12  ;;  %v1587_v43 = vmul.f32 %v2254_v0, %v2718_v18  ;;  %v1428_v2 = vpop.xlane.xlu1 %1427 }
 0x248   : > { %v1425_v6 = vpop.xlane.xlu0 %1424  ;;  %v1659_v22 = vadd.f32 %v2903_v55, %v1622_v39  ;;  %2263 = vrsqrt.f32 %v1530_v8  ;;  %v1500_v28 = vmul.f32 0.03125, %v1428_v2 }
 0x249   : > { %v1499_v14 = vmul.f32 0.03125, %v1425_v6  ;;  %1694 = vst.msk [vmem:[%s2909_s15 + $0x18] sm:$0xff] %vm1199_vm4, %v1662_v61  ;;  %v1624_v47 = vmul.f32 %v2897_v29, %v1587_v43  ;;  %2265 = vrsqrt.f32 %v1529_v15 }
 0x24a   : > { %v2256_v34 = vpop.eup %2255  ;;  %1691 = vst.msk [vmem:[%s2909_s15] sm:$0xff] %vm1199_vm4, %v1659_v22  ;;  %v1532_v51 = vadd.f32 1e-05, %v1500_v28 }
 0x24b   : > { %v1531_v24 = vadd.f32 1e-05, %v1499_v14  ;;  %v2258_v36 = vpop.eup %2257  ;;  %v1661_v18 = vadd.f32 %v2903_v55, %v1624_v47  ;;  %v1590_v48 = vmul.f32 %v2256_v34, %v2728_v33  ;;  %v1434_v32 = vpop.xlane.xlu1 %1433 }
 0x24c   : > { %v1431_v53 = vpop.xlane.xlu0 %1430  ;;  %v1589_v42 = vmul.f32 %v2258_v36, %v2723_v20  ;;  %2267 = vrsqrt.f32 %v1532_v51  ;;  %v1502_v62 = vmul.f32 0.03125, %v1434_v32 }
 0x24d   : > { %v1501_v63 = vmul.f32 0.03125, %v1431_v53  ;;  %1693 = vst.msk [vmem:[%s2909_s15 + $0x10] sm:$0xff] %vm1199_vm4, %v1661_v18  ;;  %v1627_v57 = vmul.f32 %v2897_v29, %v1590_v48  ;;  %2269 = vrsqrt.f32 %v1531_v24 }
 0x24e   : > { %v2260_v49 = vpop.eup %2259  ;;  %v1626_v46 = vmul.f32 %v2897_v29, %v1589_v42  ;;  %v1534_v31 = vadd.f32 1e-05, %v1502_v62 }
 0x24f   : > { %v1533_v1 = vadd.f32 1e-05, %v1501_v63  ;;  %v2262_v33 = vpop.eup %2261  ;;  %v1664_v45 = vadd.f32 %v2903_v55, %v1627_v57  ;;  %v1592_v20 = vmul.f32 %v2260_v49, %v2739_v50  ;;  %v1440_v4 = vpop.xlane.xlu1 %1439 }
 0x250   : > { %v1437_v35 = vpop.xlane.xlu0 %1436  ;;  %v1663_v56 = vadd.f32 %v2903_v55, %v1626_v46  ;;  %v1591_v9 = vmul.f32 %v2262_v33, %v2734_v19  ;;  %2271 = vrsqrt.f32 %v1534_v31  ;;  %v1504_v12 = vmul.f32 0.03125, %v1440_v4 }
 0x251   : > { %1696 = vst.msk [vmem:[%s2909_s15 + $0x28] sm:$0xff] %vm1199_vm4, %v1664_v45  ;;  %v1629_v0 = vmul.f32 %v2897_v29, %v1592_v20  ;;  %2273 = vrsqrt.f32 %v1533_v1  ;;  %v1503_v39 = vmul.f32 0.03125, %v1437_v35 }
 0x252   : > { %v2264_v8 = vpop.eup %2263  ;;  %1695 = vst.msk [vmem:[%s2909_s15 + $0x20] sm:$0xff] %vm1199_vm4, %v1663_v56  ;;  %v1628_v50 = vmul.f32 %v2897_v29, %v1591_v9  ;;  %v1536_v15 = vadd.f32 1e-05, %v1504_v12 }
 0x253   : > { %v2266_v61 = vpop.eup %2265  ;;  %v1666_v43 = vadd.f32 %v2903_v55, %v1629_v0  ;;  %v1594_v19 = vmul.f32 %v2264_v8, %v2751_v60  ;;  %v1535_v2 = vadd.f32 1e-05, %v1503_v39  ;;  %v1446_v6 = vpop.xlane.xlu1 %1445 }
 0x254   : > { %v1443_v22 = vpop.xlane.xlu0 %1442  ;;  %v1665_v28 = vadd.f32 %v2903_v55, %v1628_v50  ;;  %v1593_v14 = vmul.f32 %v2266_v61, %v2746_v27  ;;  %2275 = vrsqrt.f32 %v1536_v15  ;;  %v1506_v47 = vmul.f32 0.03125, %v1446_v6 }
 0x255   : > { %1698 = vst.msk [vmem:[%s2909_s15 + $0x38] sm:$0xff] %vm1199_vm4, %v1666_v43  ;;  %v1631_v34 = vmul.f32 %v2897_v29, %v1594_v19  ;;  %2277 = vrsqrt.f32 %v1535_v2  ;;  %v1505_v51 = vmul.f32 0.03125, %v1443_v22 }
 0x256   : > { %v2268_v24 = vpop.eup %2267  ;;  %1697 = vst.msk [vmem:[%s2909_s15 + $0x30] sm:$0xff] %vm1199_vm4, %v1665_v28  ;;  %v1630_v60 = vmul.f32 %v2897_v29, %v1593_v14  ;;  %v1538_v36 = vadd.f32 1e-05, %v1506_v47 }
 0x257   : > { %v2270_v18 = vpop.eup %2269  ;;  %v1668_v48 = vadd.f32 %v2903_v55, %v1631_v34  ;;  %v1596_v27 = vmul.f32 %v2268_v24, %v2763_v17  ;;  %v1537_v32 = vadd.f32 1e-05, %v1505_v51  ;;  %v1452_v53 = vpop.xlane.xlu1 %1451 }
 0x258   : > { %v1449_v42 = vpop.xlane.xlu0 %1448  ;;  %v1667_v62 = vadd.f32 %v2903_v55, %v1630_v60  ;;  %v1595_v63 = vmul.f32 %v2270_v18, %v2758_v7  ;;  %2279 = vrsqrt.f32 %v1538_v36  ;;  %v1508_v57 = vmul.f32 0.03125, %v1452_v53 }
 0x259   : > { %1700 = vst.msk [vmem:[%s2909_s15 + $0x48] sm:$0xff] %vm1199_vm4, %v1668_v48  ;;  %v1633_v49 = vmul.f32 %v2897_v29, %v1596_v27  ;;  %2281 = vrsqrt.f32 %v1537_v32  ;;  %v1507_v46 = vmul.f32 0.03125, %v1449_v42 }
 0x25a   : > { %v2272_v31 = vpop.eup %2271  ;;  %1699 = vst.msk [vmem:[%s2909_s15 + $0x40] sm:$0xff] %vm1199_vm4, %v1667_v62  ;;  %v1632_v17 = vmul.f32 %v2897_v29, %v1595_v63  ;;  %v1540_v1 = vadd.f32 1e-05, %v1508_v57 }
 0x25b   : > { %v2274_v33 = vpop.eup %2273  ;;  %v1670_v45 = vadd.f32 %v2903_v55, %v1633_v49  ;;  %v1598_v7 = vmul.f32 %v2272_v31, %v2775_v16  ;;  %v1539_v20 = vadd.f32 1e-05, %v1507_v46  ;;  %v1458_v4 = vpop.xlane.xlu1 %1457 }
 0x25c   : > { %v1455_v35 = vpop.xlane.xlu0 %1454  ;;  %v1669_v56 = vadd.f32 %v2903_v55, %v1632_v17  ;;  %v1597_v9 = vmul.f32 %v2274_v33, %v2770_v21  ;;  %2283 = vrsqrt.f32 %v1540_v1  ;;  %v1510_v12 = vmul.f32 0.03125, %v1458_v4 }
 0x25d   : > { %1702 = vst.msk [vmem:[%s2909_s15 + $0x58] sm:$0xff] %vm1199_vm4, %v1670_v45  ;;  %v1635_v0 = vmul.f32 %v2897_v29, %v1598_v7  ;;  %2285 = vrsqrt.f32 %v1539_v20  ;;  %v1509_v39 = vmul.f32 0.03125, %v1455_v35 }
 0x25e   : > { %v2276_v8 = vpop.eup %2275  ;;  %1701 = vst.msk [vmem:[%s2909_s15 + $0x50] sm:$0xff] %vm1199_vm4, %v1669_v56  ;;  %v1634_v16 = vmul.f32 %v2897_v29, %v1597_v9  ;;  %v1542_v50 = vadd.f32 1e-05, %v1510_v12 }
 0x25f   : > { %v2278_v15 = vpop.eup %2277  ;;  %v1672_v61 = vadd.f32 %v2903_v55, %v1635_v0  ;;  %v1600_v21 = vmul.f32 %v2276_v8, %v2787_v52  ;;  %v1541_v43 = vadd.f32 1e-05, %v1509_v39  ;;  %v1464_v19 = vpop.xlane.xlu1 %1463 }
 0x260   : > { %v1461_v2 = vpop.xlane.xlu0 %1460  ;;  %v1671_v6 = vadd.f32 %v2903_v55, %v1634_v16  ;;  %v1599_v22 = vmul.f32 %v2278_v15, %v2782_v38  ;;  %2287 = vrsqrt.f32 %v1542_v50  ;;  %v1512_v28 = vmul.f32 0.03125, %v1464_v19 }
 0x261   : > { %1704 = vst.msk [vmem:[%s2909_s15 + $0x68] sm:$0xff] %vm1199_vm4, %v1672_v61  ;;  %v1637_v14 = vmul.f32 %v2897_v29, %v1600_v21  ;;  %2289 = vrsqrt.f32 %v1541_v43  ;;  %v1511_v47 = vmul.f32 0.03125, %v1461_v2 }
 0x262   : > { %v2280_v34 = vpop.eup %2279  ;;  %1703 = vst.msk [vmem:[%s2909_s15 + $0x60] sm:$0xff] %vm1199_vm4, %v1671_v6  ;;  %v1636_v52 = vmul.f32 %v2897_v29, %v1599_v22  ;;  %v1544_v51 = vadd.f32 1e-05, %v1512_v28 }
 0x263   : > { %v2282_v24 = vpop.eup %2281  ;;  %v1674_v60 = vadd.f32 %v2903_v55, %v1637_v14  ;;  %v1602_v38 = vmul.f32 %v2280_v34, %v2799_v5  ;;  %v1543_v36 = vadd.f32 1e-05, %v1511_v47  ;;  %v1470_v18 = vpop.xlane.xlu1 %1469 }
 0x264   : > { %v1467_v48 = vpop.xlane.xlu0 %1466  ;;  %v1673_v27 = vadd.f32 %v2903_v55, %v1636_v52  ;;  %v1601_v32 = vmul.f32 %v2282_v24, %v2794_v58  ;;  %2291 = vrsqrt.f32 %v1544_v51  ;;  %v1514_v53 = vmul.f32 0.03125, %v1470_v18 }
 0x265   : > { %1706 = vst.msk [vmem:[%s2909_s15 + $0x78] sm:$0xff] %vm1199_vm4, %v1674_v60  ;;  %v1639_v42 = vmul.f32 %v2897_v29, %v1602_v38  ;;  %2293 = vrsqrt.f32 %v1543_v36  ;;  %v1513_v62 = vmul.f32 0.03125, %v1467_v48 }
 0x266   : > { %v2284_v63 = vpop.eup %2283  ;;  %1705 = vst.msk [vmem:[%s2909_s15 + $0x70] sm:$0xff] %vm1199_vm4, %v1673_v27  ;;  %v1638_v5 = vmul.f32 %v2897_v29, %v1601_v32  ;;  %v1546_v57 = vadd.f32 1e-05, %v1514_v53 }
 0x267   : > { %v2286_v49 = vpop.eup %2285  ;;  %v1676_v46 = vadd.f32 %v2903_v55, %v1639_v42  ;;  %v1604_v58 = vmul.f32 %v2284_v63, %v2811_v10  ;;  %v1545_v31 = vadd.f32 1e-05, %v1513_v62  ;;  %v1476_v17 = vpop.xlane.xlu1 %1475 }
 0x268   : > { %v1473_v1 = vpop.xlane.xlu0 %1472  ;;  %v1675_v33 = vadd.f32 %v2903_v55, %v1638_v5  ;;  %v1603_v45 = vmul.f32 %v2286_v49, %v2806_v3  ;;  %2295 = vrsqrt.f32 %v1546_v57  ;;  %v1516_v7 = vmul.f32 0.03125, %v1476_v17 }
 0x269   : > { %1708 = vst.msk [vmem:[%s2909_s15 + $0x88] sm:$0xff] %vm1199_vm4, %v1676_v46  ;;  %v1641_v20 = vmul.f32 %v2897_v29, %v1604_v58  ;;  %2297 = vrsqrt.f32 %v1545_v31  ;;  %v1515_v4 = vmul.f32 0.03125, %v1473_v1 }
 0x26a   : > { %v2288_v35 = vpop.eup %2287  ;;  %1707 = vst.msk [vmem:[%s2909_s15 + $0x80] sm:$0xff] %vm1199_vm4, %v1675_v33  ;;  %v1640_v10 = vmul.f32 %v2897_v29, %v1603_v45  ;;  %v1548_v56 = vadd.f32 1e-05, %v1516_v7 }
 0x26b   : > { %v2290_v9 = vpop.eup %2289  ;;  %v1678_v12 = vadd.f32 %v2903_v55, %v1641_v20  ;;  %v1606_v3 = vmul.f32 %v2288_v35, %v2823_v37  ;;  %v1547_v0 = vadd.f32 1e-05, %v1515_v4  ;;  %v1482_v39 = vpop.xlane.xlu1 %1481 }
 0x26c   : > { %v1479_v8 = vpop.xlane.xlu0 %1478  ;;  %v1677_v16 = vadd.f32 %v2903_v55, %v1640_v10  ;;  %v1605_v50 = vmul.f32 %v2290_v9, %v2818_v26  ;;  %2299 = vrsqrt.f32 %v1548_v56  ;;  %v1518_v15 = vmul.f32 0.03125, %v1482_v39 }
 0x26d   : > { %1710 = vst.msk [vmem:[%s2909_s15 + $0x98] sm:$0xff] %vm1199_vm4, %v1678_v12  ;;  %v1643_v61 = vmul.f32 %v2897_v29, %v1606_v3  ;;  %2301 = vrsqrt.f32 %v1547_v0  ;;  %v1517_v21 = vmul.f32 0.03125, %v1479_v8 }
 0x26e   : > { %v2292_v43 = vpop.eup %2291  ;;  %1709 = vst.msk [vmem:[%s2909_s15 + $0x90] sm:$0xff] %vm1199_vm4, %v1677_v16  ;;  %v1642_v37 = vmul.f32 %v2897_v29, %v1605_v50  ;;  %v1550_v19 = vadd.f32 1e-05, %v1518_v15 }
 0x26f   : > { %v2294_v2 = vpop.eup %2293  ;;  %v1680_v6 = vadd.f32 %v2903_v55, %v1643_v61  ;;  %v1608_v26 = vmul.f32 %v2292_v43, %v2835_v54  ;;  %v1549_v22 = vadd.f32 1e-05, %v1517_v21  ;;  %v1488_v28 = vpop.xlane.xlu1 %1487 }
 0x270   : > { %v1485_v14 = vpop.xlane.xlu0 %1484  ;;  %v1679_v47 = vadd.f32 %v2903_v55, %v1642_v37  ;;  %v1607_v34 = vmul.f32 %v2294_v2, %v2830_v44  ;;  %2303 = vrsqrt.f32 %v1550_v19  ;;  %v1520_v52 = vmul.f32 0.03125, %v1488_v28 }
 0x271   : > { %1712 = vst.msk [vmem:[%s2909_s15 + $0xa8] sm:$0xff] %vm1199_vm4, %v1680_v6  ;;  %v1645_v51 = vmul.f32 %v2897_v29, %v1608_v26  ;;  %2305 = vrsqrt.f32 %v1549_v22  ;;  %v1519_v24 = vmul.f32 0.03125, %v1485_v14 }
 0x272   : > { %v2296_v60 = vpop.eup %2295  ;;  %1711 = vst.msk [vmem:[%s2909_s15 + $0xa0] sm:$0xff] %vm1199_vm4, %v1679_v47  ;;  %v1644_v54 = vmul.f32 %v2897_v29, %v1607_v34  ;;  %v1552_v38 = vadd.f32 1e-05, %v1520_v52 }
 0x273   : > { %v2298_v36 = vpop.eup %2297  ;;  %v1682_v18 = vadd.f32 %v2903_v55, %v1645_v51  ;;  %v1610_v44 = vmul.f32 %v2296_v60, %v2847_v11  ;;  %v1551_v48 = vadd.f32 1e-05, %v1519_v24 }
 0x274   : > { %v1681_v27 = vadd.f32 %v2903_v55, %v1644_v54  ;;  %v1609_v32 = vmul.f32 %v2298_v36, %v2842_v59  ;;  %2307 = vrsqrt.f32 %v1552_v38 }
 0x275   : > { %1714 = vst.msk [vmem:[%s2909_s15 + $0xb8] sm:$0xff] %vm1199_vm4, %v1682_v18  ;;  %v1647_v53 = vmul.f32 %v2897_v29, %v1610_v44  ;;  %2309 = vrsqrt.f32 %v1551_v48 }
 0x276   : > { %v2300_v42 = vpop.eup %2299  ;;  %1713 = vst.msk [vmem:[%s2909_s15 + $0xb0] sm:$0xff] %vm1199_vm4, %v1681_v27  ;;  %v1646_v62 = vmul.f32 %v2897_v29, %v1609_v32 }
 0x277   : > { %v2302_v11 = vpop.eup %2301  ;;  %v1684_v63 = vadd.f32 %v2903_v55, %v1647_v53  ;;  %v1612_v5 = vmul.f32 %v2300_v42, %v2859_v25 }
 0x278   : > { %v1683_v59 = vadd.f32 %v2903_v55, %v1646_v62  ;;  %v1611_v57 = vmul.f32 %v2302_v11, %v2854_v13 }
 0x279   : > { %1716 = vst.msk [vmem:[%s2909_s15 + $0xc8] sm:$0xff] %vm1199_vm4, %v1684_v63  ;;  %v1649_v49 = vmul.f32 %v2897_v29, %v1612_v5 }
 0x27a   : > { %v2304_v46 = vpop.eup %2303  ;;  %1715 = vst.msk [vmem:[%s2909_s15 + $0xc0] sm:$0xff] %vm1199_vm4, %v1683_v59  ;;  %v1648_v58 = vmul.f32 %v2897_v29, %v1611_v57 }
 0x27b   : > { %v2306_v31 = vpop.eup %2305  ;;  %v1686_v17 = vadd.f32 %v2903_v55, %v1649_v49  ;;  %v1614_v25 = vmul.f32 %v2304_v46, %v2871_v41 }
 0x27c   : > { %v1685_v1 = vadd.f32 %v2903_v55, %v1648_v58  ;;  %v1613_v13 = vmul.f32 %v2306_v31, %v2866_v30 }
 0x27d   : > { %1718 = vst.msk [vmem:[%s2909_s15 + $0xd8] sm:$0xff] %vm1199_vm4, %v1686_v17  ;;  %v1651_v33 = vmul.f32 %v2897_v29, %v1614_v25 }
 0x27e   : > { %v2308_v45 = vpop.eup %2307  ;;  %1717 = vst.msk [vmem:[%s2909_s15 + $0xd0] sm:$0xff] %vm1199_vm4, %v1685_v1  ;;  %v1650_v7 = vmul.f32 %v2897_v29, %v1613_v13 }
 0x27f   : > { %v2310_v20 = vpop.eup %2309  ;;  %v1688_v4 = vadd.f32 %v2903_v55, %v1651_v33  ;;  %v1616_v41 = vmul.f32 %v2308_v45, %v2883_v40 }
 0x280   : > { %v1687_v35 = vadd.f32 %v2903_v55, %v1650_v7  ;;  %v1615_v30 = vmul.f32 %v2310_v20, %v2878_v23 }
 0x281   : > { %1720 = vst.msk [vmem:[%s2909_s15 + $0xe8] sm:$0xff] %vm1199_vm4, %v1688_v4  ;;  %v1653_v10 = vmul.f32 %v2897_v29, %v1616_v41 }
 0x282   : > { %1719 = vst.msk [vmem:[%s2909_s15 + $0xe0] sm:$0xff] %vm1199_vm4, %v1687_v35  ;;  %v1652_v56 = vmul.f32 %v2897_v29, %v1615_v30 }
 0x283   : > { %v1690_v9 = vadd.f32 %v2903_v55, %v1653_v10 }
 0x284   : > { %v1689_v12 = vadd.f32 %v2903_v55, %v1652_v56 }
 0x285   : > { %1722 = vst.msk [vmem:[%s2909_s15 + $0xf8] sm:$0xff] %vm1199_vm4, %v1690_v9 }
 0x286   : > { %1721 = vst.msk [vmem:[%s2909_s15 + $0xf0] sm:$0xff] %vm1199_vm4, %v1689_v12 }
 0x287 PF: > { %s13_s12 = sadd.s32 1, %s2317_s12  }
 0x288   : > { %p10_p5 = scmp.ge.s32.totalorder %s13_s12, 4  }
 0x28a   :  { %12 = sbr.rel (!%p10_p5) target bundleno = 1 (0x1), region = 64 }

</bundles_post_ra>
